<compile_context>
chip_gen: v5e
topology: v5e:2x2
jax: 0.10.0
libtpu: 0.0.40
codegen_flags: <defaults>
</compile_context>

<pallas_src>
import math
import functools

import jax
import jax.numpy as jnp
from jax.experimental import pallas as pl
from jax.experimental.pallas import tpu as pltpu


def _f2_kernel(x_ref, w0t_ref, b0_ref, w1t_ref, b1_ref, w2t_ref, b2_ref, o_ref):
    """Fused 3-layer MLP: two ReLU hidden layers + linear output, all on MXU.

    x / weights are bf16; all matmuls accumulate in fp32; biases + output fp32.
    """
    x = x_ref[...]                                                    # (bm, d) bf16
    h0 = jnp.dot(x, w0t_ref[...],
                 preferred_element_type=jnp.float32) + b0_ref[...]    # (bm, h0p) f32
    h0 = jnp.maximum(h0, 0.0).astype(jnp.bfloat16)
    h1 = jnp.dot(h0, w1t_ref[...],
                 preferred_element_type=jnp.float32) + b1_ref[...]    # (bm, h1p) f32
    h1 = jnp.maximum(h1, 0.0).astype(jnp.bfloat16)
    out = jnp.dot(h1, w2t_ref[...],
                  preferred_element_type=jnp.float32) + b2_ref[...]   # (bm, kp) f32
    o_ref[...] = out.astype(o_ref.dtype)


def _round_up(v: int, m: int) -> int:
    return ((v + m - 1) // m) * m


@functools.partial(jax.jit, static_argnames=("block_m",))
def f2_forward(x, w0, b0, w1, b1, w2, b2, *, block_m=256):
    """Pallas implementation of F2.forward.

    Args:
      x:  (n, d) float32
      w0: (h0, d), b0: (h0,)
      w1: (h1, h0), b1: (h1,)
      w2: (k, h1), b2: (k,)
      block_m: batch tile (multiple of 256 recommended; sized to fit VMEM).
    Returns:
      (n, k) float32 logits, numerically matching the PyTorch forward
      (modulo bf16 matmul inputs with fp32 accumulation).
    """
    n, d = x.shape
    h0, _ = w0.shape
    h1, _ = w1.shape
    k, _ = w2.shape

    # Lane-dense padded feature widths (multiples of 128) and padded batch.
    h0p = _round_up(h0, 128)
    h1p = _round_up(h1, 128)
    kp = _round_up(k, 128)
    n_blocks = pl.cdiv(n, block_m)
    n_pad = n_blocks * block_m

    # Wrapper-side glue (plain XLA): zero-pad batch, pre-transpose weights to
    # (in, out), zero-pad feature dims, cast MXU operands to bf16.  Padded
    # weight columns/rows and biases are zero, so padded lanes stay zero
    # through ReLU and contribute nothing; padded logits are sliced off below.
    xp = jnp.pad(x, ((0, n_pad - n), (0, 0))).astype(jnp.bfloat16)          # (n_pad, d)
    w0t = jnp.pad(w0.T, ((0, 0), (0, h0p - h0))).astype(jnp.bfloat16)       # (d, h0p)
    w1t = jnp.pad(w1.T, ((0, h0p - h0), (0, h1p - h1))).astype(jnp.bfloat16)  # (h0p, h1p)
    w2t = jnp.pad(w2.T, ((0, h1p - h1), (0, kp - k))).astype(jnp.bfloat16)    # (h1p, kp)
    b0p = jnp.pad(b0, (0, h0p - h0)).reshape(1, h0p).astype(jnp.float32)
    b1p = jnp.pad(b1, (0, h1p - h1)).reshape(1, h1p).astype(jnp.float32)
    b2p = jnp.pad(b2, (0, kp - k)).reshape(1, kp).astype(jnp.float32)

    grid = (n_blocks,)

    # Scheduler hint: total flops / bytes for the whole call.
    flops = 2 * n_pad * (d * h0p + h0p * h1p + h1p * kp)
    bytes_accessed = (
        xp.size * 2 + n_pad * kp * 4
        + (w0t.size + w1t.size + w2t.size) * 2
        + (b0p.size + b1p.size + b2p.size) * 4
    )

    out_padded = pl.pallas_call(
        _f2_kernel,
        out_shape=jax.ShapeDtypeStruct((n_pad, kp), jnp.float32),
        grid_spec=pltpu.PrefetchScalarGridSpec(
            num_scalar_prefetch=0,
            grid=grid,
            in_specs=[
                # x: only streamed operand, tiled over the batch axis.
                pl.BlockSpec((block_m, d), lambda i: (i, 0)),
                # Weights / biases: full-array blocks, constant index_map so
                # they stay resident in VMEM across the whole grid.
                pl.BlockSpec((d, h0p), lambda i: (0, 0)),
                pl.BlockSpec((1, h0p), lambda i: (0, 0)),
                pl.BlockSpec((h0p, h1p), lambda i: (0, 0)),
                pl.BlockSpec((1, h1p), lambda i: (0, 0)),
                pl.BlockSpec((h1p, kp), lambda i: (0, 0)),
                pl.BlockSpec((1, kp), lambda i: (0, 0)),
            ],
            # Lane-dense (block_m, 128) output block -> unmasked stores.
            out_specs=pl.BlockSpec((block_m, kp), lambda i: (i, 0)),
        ),
        compiler_params=pltpu.CompilerParams(
            # Batch axis is fully parallel -> megacore sharding on v7x.
            dimension_semantics=("parallel",),
            # Allow large batch tiles; actual use at these shapes is ~2 MiB.
            vmem_limit_bytes=64 * 1024 * 1024,
        ),
        cost_estimate=pl.CostEstimate(
            flops=flops, transcendentals=0, bytes_accessed=bytes_accessed
        ),
    )(xp, w0t, b0p, w1t, b1p, w2t, b2p)

    # Strip batch padding and padded logit lanes.
    return out_padded[:n, :k]


def _init_f2_params(key, h0, h1, d, k):
    """Deterministic Uniform(-1/sqrt(fan_in), 1/sqrt(fan_in)) init (matches F2.__init__ shapes)."""
    k0, k1, k2, k3, k4, k5 = jax.random.split(key, 6)
    a0 = 1.0 / math.sqrt(d)
    a1 = 1.0 / math.sqrt(h0)
    a2 = 1.0 / math.sqrt(h1)
    w0 = jax.random.uniform(k0, (h0, d), jnp.float32, -a0, a0)
    b0 = jax.random.uniform(k1, (h0,), jnp.float32, -a0, a0)
    w1 = jax.random.uniform(k2, (h1, h0), jnp.float32, -a1, a1)
    b1 = jax.random.uniform(k3, (h1,), jnp.float32, -a1, a1)
    w2 = jax.random.uniform(k4, (k, h1), jnp.float32, -a2, a2)
    b2 = jax.random.uniform(k5, (k,), jnp.float32, -a2, a2)
    return w0, b0, w1, b1, w2, b2


def _f2_reference(x, w0, b0, w1, b1, w2, b2):
    """Pure-JAX fp32 reference mirroring the PyTorch forward exactly."""
    h0 = jnp.maximum(x @ w0.T + b0, 0.0)
    h1 = jnp.maximum(h0 @ w1.T + b1, 0.0)
    return h1 @ w2.T + b2


if __name__ == "__main__":
    # MNIST-like shapes for F2: d=784 features, h0=64, h1=32 hidden units,
    # k=10 classes.  n=300 is deliberately NOT a multiple of block_m to
    # exercise the cdiv + padding path, and gives grid=(2,) so both v7x
    # TensorCores are used.
    n, d, h0, h1, k = 300, 784, 64, 32, 10

    key = jax.random.PRNGKey(0)
    kx, kparams = jax.random.split(key)
    x = jax.random.normal(kx, (n, d), dtype=jnp.float32)
    params = _init_f2_params(kparams, h0, h1, d, k)

    out = f2_forward(x, *params, block_m=256)
    out = jax.block_until_ready(out)

    ref = _f2_reference(x, *params)
    assert out.shape == (n, k), out.shape
    max_err = float(jnp.max(jnp.abs(out - ref)))
    # bf16 matmul inputs with fp32 accumulation -> loose-ish tolerance vs fp32.
    assert max_err < 5e-2, f"mismatch vs reference: max abs err = {max_err}"

    print("KERNEL_OK")
</pallas_src>

<mosaic_0001>
module attributes {stable_mosaic.version = 11 : i64} {
  func.func @_f2_kernel(%arg0: i32, %arg1: memref<256x784xbf16, #tpu.memory_space<vmem>>, %arg2: memref<784x128xbf16, #tpu.memory_space<vmem>>, %arg3: memref<1x128xf32, #tpu.memory_space<vmem>>, %arg4: memref<128x128xbf16, #tpu.memory_space<vmem>>, %arg5: memref<1x128xf32, #tpu.memory_space<vmem>>, %arg6: memref<128x128xbf16, #tpu.memory_space<vmem>>, %arg7: memref<1x128xf32, #tpu.memory_space<vmem>>, %arg8: memref<256x128xf32, #tpu.memory_space<vmem>>) attributes {dimension_semantics = [#tpu.dimension_semantics<parallel>], iteration_bounds = array<i64: 2>, scalar_prefetch = 0 : i64, scratch_operands = 0 : i64, tpu.core_type = #tpu.core_type<tc>, window_params = [{transform_indices = @transform_0, window_bounds = array<i64: 256, 784>}, {pipeline_mode = #tpu.pipeline_mode<synchronous>, transform_indices = @transform_1, window_bounds = array<i64: 784, 128>}, {pipeline_mode = #tpu.pipeline_mode<synchronous>, transform_indices = @transform_2, window_bounds = array<i64: 1, 128>}, {pipeline_mode = #tpu.pipeline_mode<synchronous>, transform_indices = @transform_3, window_bounds = array<i64: 128, 128>}, {pipeline_mode = #tpu.pipeline_mode<synchronous>, transform_indices = @transform_4, window_bounds = array<i64: 1, 128>}, {pipeline_mode = #tpu.pipeline_mode<synchronous>, transform_indices = @transform_5, window_bounds = array<i64: 128, 128>}, {pipeline_mode = #tpu.pipeline_mode<synchronous>, transform_indices = @transform_6, window_bounds = array<i64: 1, 128>}, {transform_indices = @transform_7, window_bounds = array<i64: 256, 128>}]} {
    %c0 = arith.constant 0 : index
    %c0_0 = arith.constant 0 : index
    %0 = vector.load %arg1[%c0, %c0_0] : memref<256x784xbf16, #tpu.memory_space<vmem>>, vector<256x784xbf16>
    %c0_1 = arith.constant 0 : index
    %c0_2 = arith.constant 0 : index
    %1 = vector.load %arg2[%c0_1, %c0_2] : memref<784x128xbf16, #tpu.memory_space<vmem>>, vector<784x128xbf16>
    %cst = arith.constant dense<0.000000e+00> : vector<256x128xf32>
    %2 = tpu.matmul %0, %1, %cst {dimension_numbers = #tpu.dot_dimension_numbers<[1], [0], [0], [1], [0, 0, 1, 1], [], []>} : vector<256x784xbf16>, vector<784x128xbf16>, vector<256x128xf32> -> vector<256x128xf32>
    %c0_3 = arith.constant 0 : index
    %c0_4 = arith.constant 0 : index
    %3 = vector.load %arg3[%c0_3, %c0_4] : memref<1x128xf32, #tpu.memory_space<vmem>>, vector<1x128xf32>
    %4 = vector.broadcast %3 : vector<1x128xf32> to vector<256x128xf32>
    %5 = arith.addf %2, %4 : vector<256x128xf32>
    %cst_5 = arith.constant 0.000000e+00 : f32
    %6 = vector.broadcast %cst_5 : f32 to vector<256x128xf32>
    %7 = arith.maximumf %5, %6 : vector<256x128xf32>
    %8 = arith.truncf %7 : vector<256x128xf32> to vector<256x128xbf16>
    %c0_6 = arith.constant 0 : index
    %c0_7 = arith.constant 0 : index
    %9 = vector.load %arg4[%c0_6, %c0_7] : memref<128x128xbf16, #tpu.memory_space<vmem>>, vector<128x128xbf16>
    %cst_8 = arith.constant dense<0.000000e+00> : vector<256x128xf32>
    %10 = tpu.matmul %8, %9, %cst_8 {dimension_numbers = #tpu.dot_dimension_numbers<[1], [0], [0], [1], [0, 0, 1, 1], [], []>} : vector<256x128xbf16>, vector<128x128xbf16>, vector<256x128xf32> -> vector<256x128xf32>
    %c0_9 = arith.constant 0 : index
    %c0_10 = arith.constant 0 : index
    %11 = vector.load %arg5[%c0_9, %c0_10] : memref<1x128xf32, #tpu.memory_space<vmem>>, vector<1x128xf32>
    %12 = vector.broadcast %11 : vector<1x128xf32> to vector<256x128xf32>
    %13 = arith.addf %10, %12 : vector<256x128xf32>
    %cst_11 = arith.constant 0.000000e+00 : f32
    %14 = vector.broadcast %cst_11 : f32 to vector<256x128xf32>
    %15 = arith.maximumf %13, %14 : vector<256x128xf32>
    %16 = arith.truncf %15 : vector<256x128xf32> to vector<256x128xbf16>
    %c0_12 = arith.constant 0 : index
    %c0_13 = arith.constant 0 : index
    %17 = vector.load %arg6[%c0_12, %c0_13] : memref<128x128xbf16, #tpu.memory_space<vmem>>, vector<128x128xbf16>
    %cst_14 = arith.constant dense<0.000000e+00> : vector<256x128xf32>
    %18 = tpu.matmul %16, %17, %cst_14 {dimension_numbers = #tpu.dot_dimension_numbers<[1], [0], [0], [1], [0, 0, 1, 1], [], []>} : vector<256x128xbf16>, vector<128x128xbf16>, vector<256x128xf32> -> vector<256x128xf32>
    %c0_15 = arith.constant 0 : index
    %c0_16 = arith.constant 0 : index
    %19 = vector.load %arg7[%c0_15, %c0_16] : memref<1x128xf32, #tpu.memory_space<vmem>>, vector<1x128xf32>
    %20 = vector.broadcast %19 : vector<1x128xf32> to vector<256x128xf32>
    %21 = arith.addf %18, %20 : vector<256x128xf32>
    %c0_17 = arith.constant 0 : index
    %c0_18 = arith.constant 0 : index
    %22 = vector.load %arg8[%c0_17, %c0_18] : memref<256x128xf32, #tpu.memory_space<vmem>>, vector<256x128xf32>
    tpu.vector_store %arg8[%c0_17, %c0_18], %21 {strides = array<i32>} : memref<256x128xf32, #tpu.memory_space<vmem>>, vector<256x128xf32>,
    return
  }
  func.func @transform_0(%arg0: i32) -> (i32, i32) {
    %c0_i32 = arith.constant 0 : i32
    %c0_i32_0 = arith.constant 0 : i32
    return %arg0, %c0_i32 : i32, i32
  }
  func.func @transform_1(%arg0: i32) -> (i32, i32) {
    %c0_i32 = arith.constant 0 : i32
    %c0_i32_0 = arith.constant 0 : i32
    %c0_i32_1 = arith.constant 0 : i32
    return %c0_i32, %c0_i32_0 : i32, i32
  }
  func.func @transform_2(%arg0: i32) -> (i32, i32) {
    %c0_i32 = arith.constant 0 : i32
    %c0_i32_0 = arith.constant 0 : i32
    %c0_i32_1 = arith.constant 0 : i32
    return %c0_i32, %c0_i32_0 : i32, i32
  }
  func.func @transform_3(%arg0: i32) -> (i32, i32) {
    %c0_i32 = arith.constant 0 : i32
    %c0_i32_0 = arith.constant 0 : i32
    %c0_i32_1 = arith.constant 0 : i32
    return %c0_i32, %c0_i32_0 : i32, i32
  }
  func.func @transform_4(%arg0: i32) -> (i32, i32) {
    %c0_i32 = arith.constant 0 : i32
    %c0_i32_0 = arith.constant 0 : i32
    %c0_i32_1 = arith.constant 0 : i32
    return %c0_i32, %c0_i32_0 : i32, i32
  }
  func.func @transform_5(%arg0: i32) -> (i32, i32) {
    %c0_i32 = arith.constant 0 : i32
    %c0_i32_0 = arith.constant 0 : i32
    %c0_i32_1 = arith.constant 0 : i32
    return %c0_i32, %c0_i32_0 : i32, i32
  }
  func.func @transform_6(%arg0: i32) -> (i32, i32) {
    %c0_i32 = arith.constant 0 : i32
    %c0_i32_0 = arith.constant 0 : i32
    %c0_i32_1 = arith.constant 0 : i32
    return %c0_i32, %c0_i32_0 : i32, i32
  }
  func.func @transform_7(%arg0: i32) -> (i32, i32) {
    %c0_i32 = arith.constant 0 : i32
    %c0_i32_0 = arith.constant 0 : i32
    return %arg0, %c0_i32 : i32, i32
  }
}

</mosaic_0001>

<bundles_post_ra>
// kernel: f2_forward.1
= control target key start
LH: loop header
LB: loop body
LE: loop exit
PB: predicated region body
PF: predicated region fallthrough
CT: control target
= control target key end

     0   :  { %s3536_s24 = smov 0   ;;  %s4385_s0 = inlined_call_operand.vmem [shape: bf16[512,784], index: 0, kind: input, shape index: {}]   ;;  %s4386_s1 = inlined_call_operand.vmem [shape: bf16[784,128], index: 1, kind: input, shape index: {}]   ;;  %s4387_s2 = inlined_call_operand.vmem [shape: f32[1,128], index: 2, kind: input, shape index: {}]   ;;  %s4388_s3 = inlined_call_operand.vmem [shape: bf16[128,128], index: 3, kind: input, shape index: {}]   ;;  %s4389_s4 = inlined_call_operand.vmem [shape: f32[1,128], index: 4, kind: input, shape index: {}]   ;;  %s4390_s5 = inlined_call_operand.vmem [shape: bf16[128,128], index: 5, kind: input, shape index: {}]   ;;  %s4391_s6 = inlined_call_operand.vmem [shape: f32[1,128], index: 6, kind: input, shape index: {}]   ;;  %s4392_s7 = inlined_call_operand.vmem [shape: f32[512,128], index: 7, kind: output, shape index: {}]  }
   0x1 LB: > { %s2540_s25 = sadd.s32 4294967295, %s3494_s24   ;;  %p2544_p0 = scmp.ge.s32.totalorder %s3494_s24, 1  ;;  %s3494_s24 = sphi %s3536_s24, %s17_s24  }
   0x2   : > { %p239_p1 = scmp.lt.s32.totalorder %s3494_s24, 3 }
   0x4   : > { %p240_p2 = pnand %p2544_p0, %p239_p1 }
   0x5   : > { %s2545_s9 = sshll.u32 (!%p240_p2), %s2540_s25, 5 }
   0x6   : > { %243 = sbr.rel (%p240_p2) target bundleno = 1032 (0x408), region = 48  ;;  %p273_p3 = scmp.lt.s32.totalorder (!%p240_p2), %s2545_s9, 63 }
   0xb   : > { %v3394_v0 = vld [vmem:[%s4386_s1 + $0x38] sm:$0xff]  ;;  %v3393_v1 = vld [vmem:[%s4386_s1 + $0x30] sm:$0xff]  ;;  %v3392_v2 = vld [vmem:[%s4386_s1 + $0x28] sm:$0xff]  ;;  %s4394_s9 = smov (!%p273_p3, %s2545_s9), 63  ;;  %vm1370_vm0 = vcmask 130048  }
   0xc   : > { %3452 = vmatpush.bf16.msra.mxu1 %v3394_v0  ;;  %3453 = vmatpush.bf16.msra.mxu2 %v3394_v0  ;;  %v3391_v3 = vld [vmem:[%s4386_s1 + $0x20] sm:$0xff]  ;;  %v3390_v4 = vld [vmem:[%s4386_s1 + $0x18] sm:$0xff]  ;;  %v3389_v5 = vld [vmem:[%s4386_s1 + $0x10] sm:$0xff]  ;;  %s3476_s16 = smul.u32 28, %s4394_s9  ;;  %s2548_s20 = sshll.u32 %s4394_s9, 3 }
   0xd   : > { %3454 = vmatpush.bf16.msra.mxu3 %v3394_v0  ;;  %1419 = vmatpush.bf16.msra.mxu0 %v3394_v0  ;;  %v3388_v6 = vld [vmem:[%s4386_s1 + $0x8] sm:$0xff]  ;;  %v3387_v7 = vld [vmem:[%s4386_s1] sm:$0xff]  ;;  %v3410_v12 = vld [vmem:[%s4386_s1 + $0xb8] sm:$0xff]  ;;  %s4302_s27 = scalar_lea.vmem %s4392_s7, %s2548_s20 }
   0xe   : > { %s3571_s21 = scalar_lea.vmem %s4385_s0, %s3476_s16  ;;  %v3402_v15 = vld [vmem:[%s4386_s1 + $0x78] sm:$0xff]  ;;  %v3409_v21 = vld [vmem:[%s4386_s1 + $0xb0] sm:$0xff]  ;;  %v3408_v25 = vld [vmem:[%s4386_s1 + $0xa8] sm:$0xff] }
   0xf   : > { %v2663_v8 = vld [vmem:[%s3571_s21 + $0xe0] sm:$0xf]  ;;  %v3306_v9 = vld [vmem:[%s3571_s21 + $0xf8] sm:$0xf0]  ;;  %v3401_v23 = vld [vmem:[%s4386_s1 + $0x70] sm:$0xff] }
  0x10   : > { %3455 = vmatpush.bf16.msra.mxu1 %v3393_v1  ;;  %3456 = vmatpush.bf16.msra.mxu2 %v3393_v1  ;;  %v2775_v10 = vld [vmem:[%s3571_s21 + $0x1c0] sm:$0xf]  ;;  %v3334_v11 = vld [vmem:[%s3571_s21 + $0x1d8] sm:$0xf0]  ;;  %v2664_v18 = vor.u32 %v3306_v9, %v2663_v8  ;;  %v3400_v26 = vld [vmem:[%s4386_s1 + $0x68] sm:$0xff] }
  0x11   : > { %3457 = vmatpush.bf16.msra.mxu3 %v3393_v1  ;;  %1420 = vmatpush.bf16.msra.mxu0 %v3393_v1  ;;  %v2887_v13 = vld [vmem:[%s3571_s21 + $0x2a0] sm:$0xf]  ;;  %v3362_v14 = vld [vmem:[%s3571_s21 + $0x2b8] sm:$0xf0]  ;;  %v2776_v19 = vor.u32 %v3334_v11, %v2775_v10  ;;  %v3417_v27 = vld [vmem:[%s4386_s1 + $0xf0] sm:$0xff] }
  0x12   : > { %v2551_v16 = vld [vmem:[%s3571_s21] sm:$0xf]  ;;  %v3278_v17 = vld [vmem:[%s3571_s21 + $0x18] sm:$0xf0]  ;;  %v2888_v20 = vor.u32 %v3362_v14, %v2887_v13  ;;  %v3425_v29 = vld [vmem:[%s4386_s1 + $0x130] sm:$0xff] }
  0x13   : > { %v2552_v22 = vor.u32 %v3278_v17, %v2551_v16  ;;  %v3418_v24 = vld [vmem:[%s4386_s1 + $0xf8] sm:$0xff]  ;;  %v3407_v30 = vld [vmem:[%s4386_s1 + $0xa0] sm:$0xff]  ;;  %v3416_v32 = vld [vmem:[%s4386_s1 + $0xe8] sm:$0xff] }
  0x14   : > { %3458 = vmatpush.bf16.msra.mxu1 %v3392_v2  ;;  %3459 = vmatpush.bf16.msra.mxu2 %v3392_v2  ;;  %v3426_v28 = vld [vmem:[%s4386_s1 + $0x138] sm:$0xff]  ;;  %v3399_v31 = vld [vmem:[%s4386_s1 + $0x60] sm:$0xff]  ;;  %v3313_v34 = vld [vmem:[%s3571_s21 + $0x130] sm:$0xf0] }
  0x15   : > { %3460 = vmatpush.bf16.msra.mxu3 %v3392_v2  ;;  %1421 = vmatpush.bf16.msra.mxu0 %v3392_v2  ;;  %v2691_v33 = vld [vmem:[%s3571_s21 + $0x118] sm:$0xf]  ;;  %v3341_v36 = vld [vmem:[%s3571_s21 + $0x210] sm:$0xf0]  ;;  %v3415_v43 = vld [vmem:[%s4386_s1 + $0xe0] sm:$0xff] }
  0x16   : > { %v2803_v35 = vld [vmem:[%s3571_s21 + $0x1f8] sm:$0xf]  ;;  %v3369_v38 = vld [vmem:[%s3571_s21 + $0x2f0] sm:$0xf0]  ;;  %v2692_v44 = vor.u32 %v3313_v34, %v2691_v33  ;;  %v3424_v51 = vld [vmem:[%s4386_s1 + $0x128] sm:$0xff] }
  0x17   : > { %v2915_v37 = vld [vmem:[%s3571_s21 + $0x2d8] sm:$0xf]  ;;  %v3285_v41 = vld [vmem:[%s3571_s21 + $0x50] sm:$0xf0]  ;;  %v2804_v45 = vor.u32 %v3341_v36, %v2803_v35  ;;  %v3404_v52 = vld [vmem:[%s4386_s1 + $0x88] sm:$0xff] }
  0x18   : > { %3461 = vmatpush.bf16.msra.mxu1 %v3391_v3  ;;  %3462 = vmatpush.bf16.msra.mxu2 %v3391_v3  ;;  %v2579_v39 = vld [vmem:[%s3571_s21 + $0x38] sm:$0xf]  ;;  %v2916_v46 = vor.u32 %v3369_v38, %v2915_v37  ;;  %v3405_v48 = vld [vmem:[%s4386_s1 + $0x90] sm:$0xff]  ;;  %v3396_v53 = vld [vmem:[%s4386_s1 + $0x48] sm:$0xff] }
  0x19   : > { %3463 = vmatpush.bf16.msra.mxu3 %v3391_v3  ;;  %1422 = vmatpush.bf16.msra.mxu0 %v3391_v3  ;;  %v3406_v40 = vld [vmem:[%s4386_s1 + $0x98] sm:$0xff]  ;;  %v2580_v47 = vor.u32 %v3285_v41, %v2579_v39  ;;  %v3397_v49 = vld [vmem:[%s4386_s1 + $0x50] sm:$0xff]  ;;  %v3423_v55 = vld [vmem:[%s4386_s1 + $0x120] sm:$0xff] }
  0x1a   : > { %v3398_v42 = vld [vmem:[%s4386_s1 + $0x58] sm:$0xff]  ;;  %v3413_v54 = vld [vmem:[%s4386_s1 + $0xd0] sm:$0xff]  ;;  %v3403_v56 = vld [vmem:[%s4386_s1 + $0x80] sm:$0xff] }
  0x1b   : > { %v3414_v50 = vld [vmem:[%s4386_s1 + $0xd8] sm:$0xff]  ;;  %v3412_v57 = vld [vmem:[%s4386_s1 + $0xc8] sm:$0xff]  ;;  %v3395_v58 = vld [vmem:[%s4386_s1 + $0x40] sm:$0xff] }
  0x1c   : > { %3464 = vmatpush.bf16.msra.mxu1 %v3390_v4  ;;  %3465 = vmatpush.bf16.msra.mxu2 %v3390_v4  ;;  %v2719_v59 = vld [vmem:[%s3571_s21 + $0x150] sm:$0xf]  ;;  %v3422_v60 = vld [vmem:[%s4386_s1 + $0x118] sm:$0xff]  ;;  %v3320_v61 = vld [vmem:[%s3571_s21 + $0x168] sm:$0xf0] }
  0x1d   : > { %3466 = vmatpush.bf16.msra.mxu3 %v3390_v4  ;;  %1423 = vmatpush.bf16.msra.mxu0 %v3390_v4  ;;  %v2831_v62 = vld [vmem:[%s3571_s21 + $0x230] sm:$0xf]  ;;  %v3348_v63 = vld [vmem:[%s3571_s21 + $0x248] sm:$0xf0]  ;;  %v3411_v4 = vld [vmem:[%s4386_s1 + $0xc0] sm:$0xff] }
  0x1e   : > { %v2943_v0 = vld [vmem:[%s3571_s21 + $0x310] sm:$0xf]  ;;  %v3376_v1 = vld [vmem:[%s3571_s21 + $0x328] sm:$0xf0]  ;;  %v3435_v10 = vld [vmem:[%s4386_s1 + $0x180] sm:$0xff] }
  0x1f   : > { %v2607_v2 = vld [vmem:[%s3571_s21 + $0x70] sm:$0xf]  ;;  %v3292_v3 = vld [vmem:[%s3571_s21 + $0x88] sm:$0xf0]  ;;  %v3419_v13 = vld [vmem:[%s4386_s1 + $0x100] sm:$0xff] }
  0x20   : > { %3467 = vmatpush.bf16.msra.mxu1 %v3389_v5  ;;  %3468 = vmatpush.bf16.msra.mxu2 %v3389_v5  ;;  %v3421_v8 = vld [vmem:[%s4386_s1 + $0x110] sm:$0xff]  ;;  %v2608_v9 = vor.u32 %v3292_v3, %v2607_v2  ;;  %v3420_v11 = vld [vmem:[%s4386_s1 + $0x108] sm:$0xff]  ;;  %v3355_v17 = vld [vmem:[%s3571_s21 + $0x280] sm:$0xf0] }
  0x21   : > { %3469 = vmatpush.bf16.msra.mxu3 %v3389_v5  ;;  %1424 = vmatpush.bf16.msra.mxu0 %v3389_v5  ;;  %v2720_v5 = vor.u32 %v3320_v61, %v2719_v59  ;;  %v2747_v14 = vld [vmem:[%s3571_s21 + $0x188] sm:$0xf]  ;;  %v3280_v33 = vld [vmem:[%s3571_s21 + $0x28] sm:$0xf0]  ;;  %v3433_v38 = vld [vmem:[%s4386_s1 + $0x170] sm:$0xff] }
  0x22   : > { %v2859_v16 = vld [vmem:[%s3571_s21 + $0x268] sm:$0xf]  ;;  %v3282_v39 = vld [vmem:[%s3571_s21 + $0x3c] sm:$0xf]  ;;  %v2587_v41 = vld [vmem:[%s3571_s21 + $0x40] sm:$0xf] }
  0x23   : > { %v2643_v2 = vld [vmem:[%s3571_s21 + $0xb0] sm:$0xf]  ;;  %v3300_v3 = vld [vmem:[%s3571_s21 + $0xc8] sm:$0xf0] }
  0x24   : > { %3470 = vmatpush.bf16.msra.mxu1 %v3388_v6  ;;  %3471 = vmatpush.bf16.msra.mxu2 %v3388_v6 }
  0x25   : > { %3472 = vmatpush.bf16.msra.mxu3 %v3388_v6  ;;  %1425 = vmatpush.bf16.msra.mxu0 %v3388_v6  ;;  %v2832_v6 = vor.u32 %v3348_v63, %v2831_v62  ;;  %v3432_v63 = vld [vmem:[%s4386_s1 + $0x168] sm:$0xff] }
  0x28   : > { %3473 = vmatpush.bf16.msra.mxu1 %v3387_v7  ;;  %3474 = vmatpush.bf16.msra.mxu2 %v3387_v7 }
  0x29   : > { %3475 = vmatpush.bf16.msra.mxu3 %v3387_v7  ;;  %1426 = vmatpush.bf16.msra.mxu0 %v3387_v7  ;;  %v2944_v7 = vor.u32 %v3376_v1, %v2943_v0  ;;  %v3296_v0 = vld [vmem:[%s3571_s21 + $0xac] sm:$0xf]  ;;  %v2637_v1 = vld [vmem:[%s3571_s21 + $0xc4] sm:$0xf0] }
  0x2b   : > { %1447 = vmatmul.bf16.vlgmr.msra.gmra.mxu1 %v2664_v18  ;;  %1467 = vmatmul.bf16.vlgmr.msra.gmra.mxu2 %v2776_v19  ;;  %v2971_v18 = vld [vmem:[%s3571_s21 + $0x348] sm:$0xf]  ;;  %v3383_v19 = vld [vmem:[%s3571_s21 + $0x360] sm:$0xf0] }
  0x2c   : > { %1597 = vmatpush.bf16.msrb.mxu2 %v3410_v12  ;;  %1508 = vmatpush.bf16.msrb.mxu1 %v3402_v15  ;;  %v3434_v12 = vld [vmem:[%s4386_s1 + $0x178] sm:$0xff]  ;;  %v3327_v15 = vld [vmem:[%s3571_s21 + $0x1a0] sm:$0xf0] }
  0x2d   : > { %1487 = vmatmul.bf16.vlgmr.msra.gmra.mxu3 %v2888_v20  ;;  %1427 = vmatmul.bf16.vlgmr.msra.gmra.mxu0 %v2552_v22  ;;  %v2635_v20 = vld [vmem:[%s3571_s21 + $0xa8] sm:$0xf]  ;;  %v2748_v22 = vor.u32 %v3327_v15, %v2747_v14  ;;  %v3307_v15 = vld [vmem:[%s3571_s21 + $0x100] sm:$0xf0] }
  0x2e   : > { %1686 = vmatpush.bf16.msrb.mxu3 %v3418_v24  ;;  %1775 = vmatpush.bf16.msrb.mxu0 %v3426_v28  ;;  %v2972_v24 = vor.u32 %v3383_v19, %v2971_v18  ;;  %v2559_v28 = vld [vmem:[%s3571_s21 + $0x8] sm:$0xf]  ;;  %v2679_v19 = vld [vmem:[%s3571_s21 + $0xf0] sm:$0xf] }
  0x2f   : > { %v2671_v14 = vld [vmem:[%s3571_s21 + $0xe8] sm:$0xf] }
  0x30   : > { %1598 = vmatpush.bf16.msrb.mxu2 %v3409_v21  ;;  %1509 = vmatpush.bf16.msrb.mxu1 %v3401_v23  ;;  %v3299_v21 = vld [vmem:[%s3571_s21 + $0xc0] sm:$0xf0]  ;;  %v2860_v23 = vor.u32 %v3355_v17, %v2859_v16  ;;  %v3755_v16 = vld [vmem:[%s4387_s2] ss:$0 sm:$0xff]  ;;  %v3304_v17 = vld [vmem:[%s3571_s21 + $0xec] sm:$0xf] }
  0x31   : > { %v2673_v18 = vld [vmem:[%s3571_s21 + $0x104] sm:$0xf0] }
  0x32   : > { %1687 = vmatpush.bf16.msrb.mxu3 %v3417_v27  ;;  %1776 = vmatpush.bf16.msrb.mxu0 %v3425_v29  ;;  %v2553_v27 = vld [vmem:[%s3571_s21 + $0x1c] sm:$0xf0]  ;;  %v3279_v29 = vld [vmem:[%s3571_s21 + $0x20] sm:$0xf0] }
  0x33   : > { %v2560_v35 = vor.u32 %v3279_v29, %v2559_v28 }
  0x34   : > { %1599 = vmatpush.bf16.msrb.mxu2 %v3408_v25  ;;  %1510 = vmatpush.bf16.msrb.mxu1 %v3400_v26  ;;  %v2636_v25 = vor.u32 %v3299_v21, %v2635_v20  ;;  %v3275_v26 = vld [vmem:[%s3571_s21 + $0x4] sm:$0xf]  ;;  %v3308_v20 = vld [vmem:[%s3571_s21 + $0x108] sm:$0xf0] }
  0x35   : > { %v2556_v34 = vor.u32 %v3275_v26, %v2553_v27  ;;  %v2680_v26 = vor.u32 %v3308_v20, %v2679_v19 }
  0x36   : > { %1688 = vmatpush.bf16.msrb.mxu3 %v3416_v32  ;;  %1777 = vmatpush.bf16.msrb.mxu0 %v3424_v51  ;;  %v2567_v32 = vld [vmem:[%s3571_s21 + $0x10] sm:$0xf]  ;;  %v3289_v51 = vld [vmem:[%s3571_s21 + $0x74] sm:$0xf] }
  0x37   : > { %v2568_v37 = vor.u32 %v3280_v33, %v2567_v32 }
  0x38   : > { %1600 = vmatpush.bf16.msrb.mxu2 %v3407_v30  ;;  %1511 = vmatpush.bf16.msrb.mxu1 %v3399_v31  ;;  %v3276_v30 = vld [vmem:[%s3571_s21 + $0xc] sm:$0xf]  ;;  %v2561_v31 = vld [vmem:[%s3571_s21 + $0x24] sm:$0xf0] }
  0x39   : > { %v2564_v36 = vor.u32 %v3276_v30, %v2561_v31  ;;  %v3431_v31 = vld [vmem:[%s4386_s1 + $0x160] sm:$0xff] }
  0x3a   : > { %1689 = vmatpush.bf16.msrb.mxu3 %v3415_v43  ;;  %1778 = vmatpush.bf16.msrb.mxu0 %v3423_v55  ;;  %v3283_v43 = vld [vmem:[%s3571_s21 + $0x44] sm:$0xf]  ;;  %v3290_v55 = vld [vmem:[%s3571_s21 + $0x7c] sm:$0xf] }
  0x3b   : > { %1452 = vmatmul.bf16.gmra.mxu1 %v2692_v44  ;;  %1472 = vmatmul.bf16.gmra.mxu2 %v2804_v45  ;;  %v2589_v44 = vld [vmem:[%s3571_s21 + $0x5c] sm:$0xf0]  ;;  %v2595_v45 = vld [vmem:[%s3571_s21 + $0x48] sm:$0xf] }
  0x3c   : > { %1601 = vmatpush.bf16.msrb.mxu2 %v3406_v40  ;;  %1512 = vmatpush.bf16.msrb.mxu1 %v3398_v42  ;;  %v2581_v40 = vld [vmem:[%s3571_s21 + $0x54] sm:$0xf0]  ;;  %v3286_v42 = vld [vmem:[%s3571_s21 + $0x58] sm:$0xf0] }
  0x3d   : > { %1492 = vmatmul.bf16.gmra.mxu3 %v2916_v46  ;;  %1432 = vmatmul.bf16.gmra.mxu0 %v2580_v47  ;;  %v3287_v46 = vld [vmem:[%s3571_s21 + $0x60] sm:$0xf0]  ;;  %v2584_v47 = vor.u32 %v3282_v39, %v2581_v40  ;;  %v3314_v39 = vld [vmem:[%s3571_s21 + $0x138] sm:$0xf0] }
  0x3e   : > { %1690 = vmatpush.bf16.msrb.mxu3 %v3414_v50  ;;  %1779 = vmatpush.bf16.msrb.mxu0 %v3422_v60  ;;  %v2596_v50 = vor.u32 %v3287_v46, %v2595_v45  ;;  %v3311_v40 = vld [vmem:[%s3571_s21 + $0x124] sm:$0xf] }
  0x40   : > { %1602 = vmatpush.bf16.msrb.mxu2 %v3405_v48  ;;  %1513 = vmatpush.bf16.msrb.mxu1 %v3397_v49  ;;  %v2588_v48 = vor.u32 %v3286_v42, %v2587_v41  ;;  %v2592_v49 = vor.u32 %v3283_v43, %v2589_v44  ;;  %v2701_v41 = vld [vmem:[%s3571_s21 + $0x13c] sm:$0xf0]  ;;  %v2707_v43 = vld [vmem:[%s3571_s21 + $0x128] sm:$0xf]  ;;  %v3315_v44 = vld [vmem:[%s3571_s21 + $0x140] sm:$0xf0] }
  0x42   : > { %1691 = vmatpush.bf16.msrb.mxu3 %v3413_v54  ;;  %1780 = vmatpush.bf16.msrb.mxu0 %v3421_v8  ;;  %v3293_v54 = vld [vmem:[%s3571_s21 + $0x90] sm:$0xf0]  ;;  %v2640_v8 = vor.u32 %v3296_v0, %v2637_v1  ;;  %v2727_v0 = vld [vmem:[%s3571_s21 + $0x158] sm:$0xf] }
  0x43   : > { %v3321_v1 = vld [vmem:[%s3571_s21 + $0x170] sm:$0xf0] }
  0x44   : > { %1603 = vmatpush.bf16.msrb.mxu2 %v3404_v52  ;;  %1514 = vmatpush.bf16.msrb.mxu1 %v3396_v53  ;;  %v2609_v52 = vld [vmem:[%s3571_s21 + $0x8c] sm:$0xf0]  ;;  %v2615_v53 = vld [vmem:[%s3571_s21 + $0x78] sm:$0xf] }
  0x45   : > { %v2612_v59 = vor.u32 %v3289_v51, %v2609_v52  ;;  %v2616_v60 = vor.u32 %v3293_v54, %v2615_v53  ;;  %v2704_v51 = vor.u32 %v3311_v40, %v2701_v41  ;;  %v2708_v53 = vor.u32 %v3315_v44, %v2707_v43  ;;  %v3329_v40 = vld [vmem:[%s3571_s21 + $0x1b0] sm:$0xf0] }
  0x46   : > { %1692 = vmatpush.bf16.msrb.mxu3 %v3412_v57  ;;  %1781 = vmatpush.bf16.msrb.mxu0 %v3420_v11  ;;  %v2623_v57 = vld [vmem:[%s3571_s21 + $0x80] sm:$0xf] }
  0x48   : > { %1604 = vmatpush.bf16.msrb.mxu2 %v3403_v56  ;;  %1515 = vmatpush.bf16.msrb.mxu1 %v3395_v58  ;;  %v2617_v56 = vld [vmem:[%s3571_s21 + $0x94] sm:$0xf0]  ;;  %v3294_v58 = vld [vmem:[%s3571_s21 + $0x98] sm:$0xf0] }
  0x49   : > { %v2620_v61 = vor.u32 %v3290_v55, %v2617_v56  ;;  %v2624_v62 = vor.u32 %v3294_v58, %v2623_v57 }
  0x4a   : > { %1693 = vmatpush.bf16.msrb.mxu3 %v3411_v4  ;;  %1782 = vmatpush.bf16.msrb.mxu0 %v3419_v13  ;;  %v3297_v4 = vld [vmem:[%s3571_s21 + $0xb4] sm:$0xf]  ;;  %v2665_v13 = vld [vmem:[%s3571_s21 + $0xfc] sm:$0xf0] }
  0x4b   : > { %1457 = vmatmul.bf16.gmra.mxu1 %v2720_v5  ;;  %1477 = vmatmul.bf16.gmra.mxu2 %v2832_v6  ;;  %v2645_v5 = vld [vmem:[%s3571_s21 + $0xcc] sm:$0xf0]  ;;  %v2651_v6 = vld [vmem:[%s3571_s21 + $0xb8] sm:$0xf] }
  0x4c   : > { %1960 = vmatpush.bf16.msra.mxu2 %v3435_v10  ;;  %1864 = vmatpush.bf16.msra.mxu1 %v3434_v12  ;;  %v2648_v10 = vor.u32 %v3297_v4, %v2645_v5  ;;  %v3303_v12 = vld [vmem:[%s3571_s21 + $0xe4] sm:$0xf]  ;;  %v2735_v5 = vld [vmem:[%s3571_s21 + $0x160] sm:$0xf] }
  0x4d   : > { %1497 = vmatmul.bf16.gmra.mxu3 %v2944_v7  ;;  %1437 = vmatmul.bf16.gmra.mxu0 %v2608_v9  ;;  %v3301_v7 = vld [vmem:[%s3571_s21 + $0xd0] sm:$0xf0]  ;;  %v2644_v9 = vor.u32 %v3300_v3, %v2643_v2  ;;  %v2668_v21 = vor.u32 %v3303_v12, %v2665_v13  ;;  %v3318_v2 = vld [vmem:[%s3571_s21 + $0x15c] sm:$0xf]  ;;  %v2729_v3 = vld [vmem:[%s3571_s21 + $0x174] sm:$0xf0] }
  0x4e   : > { %v2652_v11 = vor.u32 %v3301_v7, %v2651_v6  ;;  %v3322_v6 = vld [vmem:[%s3571_s21 + $0x178] sm:$0xf0]  ;;  %v2732_v13 = vor.u32 %v3318_v2, %v2729_v3  ;;  %v3331_v3 = vld [vmem:[%s3571_s21 + $0x1c4] sm:$0xf] }
  0x50   : > { %1865 = vmatpush.bf16.msra.mxu1 %v3433_v38  ;;  %v2699_v38 = vld [vmem:[%s3571_s21 + $0x120] sm:$0xf] }
  0x54   : > { %1866 = vmatpush.bf16.msra.mxu1 %v3432_v63  ;;  %v2721_v63 = vld [vmem:[%s3571_s21 + $0x16c] sm:$0xf0] }
  0x58   : > { %1867 = vmatpush.bf16.msra.mxu1 %v3431_v31  ;;  %v2755_v31 = vld [vmem:[%s3571_s21 + $0x190] sm:$0xf] }
  0x5b   : > { %1462 = vmatmul.bf16.gmra.mxu1 %v2748_v22  ;;  %1482 = vmatmul.bf16.gmra.mxu2 %v2860_v23  ;;  %v2672_v22 = vor.u32 %v3307_v15, %v2671_v14  ;;  %v2736_v15 = vor.u32 %v3322_v6, %v2735_v5  ;;  %v2783_v5 = vld [vmem:[%s3571_s21 + $0x1c8] sm:$0xf]  ;;  %v3335_v6 = vld [vmem:[%s3571_s21 + $0x1e0] sm:$0xf0] }
  0x5d   : > { %1502 = vmatmul.bf16.gmra.mxu3 %v2972_v24  ;;  %1442 = vmatmul.bf16.gmra.mxu0 %v2636_v25  ;;  %v2676_v24 = vor.u32 %v3304_v17, %v2673_v18 }
  0x6b   : > { %1516 = vmatmul.bf16.vlgmr.msrb.gmra.mxu1 %v2556_v34  ;;  %1605 = vmatmul.bf16.vlgmr.msrb.gmra.mxu2 %v2560_v35 }
  0x6d   : > { %1694 = vmatmul.bf16.vlgmr.msrb.gmra.mxu3 %v2564_v36  ;;  %1783 = vmatmul.bf16.vlgmr.msrb.gmra.mxu0 %v2568_v37  ;;  %v3310_v36 = vld [vmem:[%s3571_s21 + $0x11c] sm:$0xf]  ;;  %v2693_v37 = vld [vmem:[%s3571_s21 + $0x134] sm:$0xf0] }
  0x7b   : > { %1521 = vmatmul.bf16.gmra.mxu1 %v2584_v47  ;;  %1610 = vmatmul.bf16.gmra.mxu2 %v2588_v48  ;;  %v2696_v47 = vor.u32 %v3310_v36, %v2693_v37  ;;  %v2700_v48 = vor.u32 %v3314_v39, %v2699_v38  ;;  %v3325_v36 = vld [vmem:[%s3571_s21 + $0x194] sm:$0xf]  ;;  %v2757_v37 = vld [vmem:[%s3571_s21 + $0x1ac] sm:$0xf0]  ;;  %v2763_v39 = vld [vmem:[%s3571_s21 + $0x198] sm:$0xf] }
  0x7d   : > { %1699 = vmatmul.bf16.gmra.mxu3 %v2592_v49  ;;  %1788 = vmatmul.bf16.gmra.mxu0 %v2596_v50 }
  0x8b   : > { %1526 = vmatmul.bf16.gmra.mxu1 %v2612_v59  ;;  %1615 = vmatmul.bf16.gmra.mxu2 %v2616_v60 }
  0x8d   : > { %1704 = vmatmul.bf16.gmra.mxu3 %v2620_v61  ;;  %1793 = vmatmul.bf16.gmra.mxu0 %v2624_v62  ;;  %v3317_v62 = vld [vmem:[%s3571_s21 + $0x154] sm:$0xf] }
  0x9b   : > { %1531 = vmatmul.bf16.gmra.mxu1 %v2640_v8  ;;  %1620 = vmatmul.bf16.gmra.mxu2 %v2644_v9  ;;  %v2724_v9 = vor.u32 %v3317_v62, %v2721_v63 }
  0x9d   : > { %1709 = vmatmul.bf16.gmra.mxu3 %v2648_v10  ;;  %1798 = vmatmul.bf16.gmra.mxu0 %v2652_v11  ;;  %v2728_v10 = vor.u32 %v3321_v1, %v2727_v0 }
  0xa8   : > { %v1448_v23 = vpop.f32.mrf.mxu1 }
  0xa9   : > { %v3762_v25 = vadd.f32 %v3755_v16, %v1448_v23 }
  0xaa   : > { %v3764_v27 = vpop.f32.mrf.mxu0 }
  0xab   : > { %1536 = vmatmul.bf16.gmra.mxu1 %v2668_v21  ;;  %1625 = vmatmul.bf16.gmra.mxu2 %v2672_v22  ;;  %v3430_v21 = vld [vmem:[%s4386_s1 + $0x158] sm:$0xff] }
  0xac   : > { %1868 = vmatpush.bf16.msra.mxu1 %v3430_v21 }
  0xad   : > { %1714 = vmatmul.bf16.gmra.mxu3 %v2676_v24  ;;  %1803 = vmatmul.bf16.gmra.mxu0 %v2680_v26 }
  0xae   : > { %v1468_v28 = vpop.f32.mrf.mxu2 }
  0xaf   : > { %v3767_v29 = vadd.f32 %v3755_v16, %v1468_v28  ;;  %v3324_v28 = vld [vmem:[%s3571_s21 + $0x18c] sm:$0xf] }
  0xb0   : > { %v1488_v30 = vpop.f32.mrf.mxu3  ;;  %v1450_v32 = vpop.f32.mrf.mxu1 }
  0xb1   : > { %v3773_v33 = vadd.f32 %v3755_v16, %v1488_v30  ;;  %v3776_v34 = vadd.f32 %v3755_v16, %v1450_v32  ;;  %v2749_v30 = vld [vmem:[%s3571_s21 + $0x1a4] sm:$0xf0]  ;;  %v3328_v32 = vld [vmem:[%s3571_s21 + $0x1a8] sm:$0xf0] }
  0xb2   : > { %v3778_v35 = vpop.f32.mrf.mxu0  ;;  %v2752_v43 = vor.u32 %v3324_v28, %v2749_v30  ;;  %v2756_v44 = vor.u32 %v3328_v32, %v2755_v31 }
  0xb6   : > { %v1470_v42 = vpop.f32.mrf.mxu2 }
  0xb7   : > { %v3789_v45 = vadd.f32 %v3755_v16, %v1470_v42 }
  0xb8   : > { %v1490_v46 = vpop.f32.mrf.mxu3  ;;  %v1453_v49 = vpop.f32.mrf.mxu1 }
  0xb9   : > { %v3792_v50 = vadd.f32 %v3755_v16, %v1490_v46  ;;  %v3795_v52 = vadd.f32 %v3755_v16, %v1453_v49 }
  0xba   : > { %v3797_v54 = vpop.f32.mrf.mxu0 }
  0xbb   : > { %1541 = vmatmul.bf16.gmra.mxu1 %v2696_v47  ;;  %1630 = vmatmul.bf16.gmra.mxu2 %v2700_v48  ;;  %v2760_v48 = vor.u32 %v3325_v36, %v2757_v37 }
  0xbd   : > { %1719 = vmatmul.bf16.gmra.mxu3 %v2704_v51  ;;  %1808 = vmatmul.bf16.gmra.mxu0 %v2708_v53  ;;  %v2764_v51 = vor.u32 %v3329_v40, %v2763_v39 }
  0xbe   : > { %v1473_v55 = vpop.f32.mrf.mxu2 }
  0xbf   : > { %v3800_v56 = vadd.f32 %v3755_v16, %v1473_v55  ;;  %v3443_v55 = vld [vmem:[%s4388_s3 + $0x38] sm:$0xff] }
  0xc0   : > { %v1493_v57 = vpop.f32.mrf.mxu3  ;;  %v1455_v58 = vpop.f32.mrf.mxu1  ;;  %2158 = vmatpush.bf16.msra.mxu3 %v3443_v55  ;;  %v2805_v55 = vld [vmem:[%s3571_s21 + $0x214] sm:$0xf0] }
  0xc1   : > { %v3803_v59 = vadd.f32 %v3755_v16, %v1493_v57  ;;  %v3806_v60 = vadd.f32 %v3755_v16, %v1455_v58 }
  0xc2   : > { %v3808_v61 = vpop.f32.mrf.mxu0 }
  0xc6   : > { %v1475_v4 = vpop.f32.mrf.mxu2 }
  0xc7   : > { %v3819_v7 = vadd.f32 %v3755_v16, %v1475_v4  ;;  %v2777_v4 = vld [vmem:[%s3571_s21 + $0x1dc] sm:$0xf0] }
  0xc8   : > { %v1495_v8 = vpop.f32.mrf.mxu3  ;;  %v1458_v11 = vpop.f32.mrf.mxu1  ;;  %v2780_v21 = vor.u32 %v3331_v3, %v2777_v4  ;;  %v3339_v3 = vld [vmem:[%s3571_s21 + $0x204] sm:$0xf]  ;;  %v2813_v4 = vld [vmem:[%s3571_s21 + $0x21c] sm:$0xf0] }
  0xc9   : > { %v3822_v12 = vadd.f32 %v3755_v16, %v1495_v8  ;;  %v3825_v14 = vadd.f32 %v3755_v16, %v1458_v11  ;;  %v1429_v8 = vadd.f32 %v3755_v16, %v3764_v27  ;;  %v1431_v27 = vadd.f32 %v3755_v16, %v3778_v35  ;;  %v3338_v35 = vld [vmem:[%s3571_s21 + $0x1fc] sm:$0xf] }
  0xca   : > { %v3827_v17 = vpop.f32.mrf.mxu0 }
  0xcb   : > { %1546 = vmatmul.bf16.gmra.mxu1 %v2724_v9  ;;  %1635 = vmatmul.bf16.gmra.mxu2 %v2728_v10  ;;  %v3332_v9 = vld [vmem:[%s3571_s21 + $0x1cc] sm:$0xf]  ;;  %v2785_v10 = vld [vmem:[%s3571_s21 + $0x1e4] sm:$0xf0] }
  0xcc   : > { %v2788_v31 = vor.u32 %v3332_v9, %v2785_v10 }
  0xcd   : > { %1724 = vmatmul.bf16.gmra.mxu3 %v2732_v13  ;;  %1813 = vmatmul.bf16.gmra.mxu0 %v2736_v15  ;;  %v2791_v13 = vld [vmem:[%s3571_s21 + $0x1d0] sm:$0xf]  ;;  %v3336_v15 = vld [vmem:[%s3571_s21 + $0x1e8] sm:$0xf0] }
  0xce   : > { %v1478_v18 = vpop.f32.mrf.mxu2  ;;  %v2792_v36 = vor.u32 %v3336_v15, %v2791_v13 }
  0xcf   : > { %v3830_v19 = vadd.f32 %v3755_v16, %v1478_v18 }
  0xd0   : > { %v1498_v20 = vpop.f32.mrf.mxu3  ;;  %v1460_v22 = vpop.f32.mrf.mxu1 }
  0xd1   : > { %v3836_v23 = vadd.f32 %v3755_v16, %v1498_v20  ;;  %v3839_v24 = vadd.f32 %v3755_v16, %v1460_v22  ;;  %v2784_v22 = vor.u32 %v3335_v6, %v2783_v5  ;;  %v2819_v6 = vld [vmem:[%s3571_s21 + $0x208] sm:$0xf] }
  0xd2   : > { %v3841_v26 = vpop.f32.mrf.mxu0 }
  0xd6   : > { %v1480_v38 = vpop.f32.mrf.mxu2 }
  0xd7   : > { %v3852_v41 = vadd.f32 %v3755_v16, %v1480_v38 }
  0xd8   : > { %v1500_v42 = vpop.f32.mrf.mxu3  ;;  %v1463_v46 = vpop.f32.mrf.mxu1 }
  0xd9   : > { %v3855_v47 = vadd.f32 %v3755_v16, %v1500_v42  ;;  %v3858_v49 = vadd.f32 %v3755_v16, %v1463_v46  ;;  %v3429_v42 = vld [vmem:[%s4386_s1 + $0x150] sm:$0xff] }
  0xda   : > { %v3860_v53 = vpop.f32.mrf.mxu0  ;;  %1869 = vmatpush.bf16.msra.mxu1 %v3429_v42 }
  0xdb   : > { %1551 = vmatmul.bf16.gmra.mxu1 %v2752_v43  ;;  %1640 = vmatmul.bf16.gmra.mxu2 %v2756_v44 }
  0xdd   : > { %1729 = vmatmul.bf16.gmra.mxu3 %v2760_v48  ;;  %1818 = vmatmul.bf16.gmra.mxu0 %v2764_v51 }
  0xde   : > { %v1483_v57 = vpop.f32.mrf.mxu2 }
  0xdf   : > { %v3866_v58 = vadd.f32 %v3755_v16, %v1483_v57  ;;  %v2811_v57 = vld [vmem:[%s3571_s21 + $0x200] sm:$0xf] }
  0xe0   : > { %v1503_v62 = vpop.f32.mrf.mxu3  ;;  %v1465_v63 = vpop.f32.mrf.mxu1 }
  0xe1   : > { %v3869_v0 = vadd.f32 %v3755_v16, %v1503_v62  ;;  %v3872_v1 = vadd.f32 %v3755_v16, %v1465_v63  ;;  %v3342_v62 = vld [vmem:[%s3571_s21 + $0x218] sm:$0xf0]  ;;  %v1434_v63 = vadd.f32 %v3755_v16, %v3797_v54  ;;  %v3442_v54 = vld [vmem:[%s4388_s3 + $0x30] sm:$0xff] }
  0xe2   : > { %v3874_v2 = vpop.f32.mrf.mxu0  ;;  %v2812_v13 = vor.u32 %v3342_v62, %v2811_v57  ;;  %2159 = vmatpush.bf16.msra.mxu3 %v3442_v54  ;;  %v3346_v57 = vld [vmem:[%s3571_s21 + $0x23c] sm:$0xf]  ;;  %v2841_v62 = vld [vmem:[%s3571_s21 + $0x254] sm:$0xf0] }
  0xe6   : > { %v1485_v11 = vpop.f32.mrf.mxu2 }
  0xe7   : > { %v3887_v18 = vadd.f32 %v3755_v16, %v1485_v11  ;;  %v2808_v11 = vor.u32 %v3338_v35, %v2805_v55  ;;  %v2839_v35 = vld [vmem:[%s3571_s21 + $0x238] sm:$0xf]  ;;  %v3349_v55 = vld [vmem:[%s3571_s21 + $0x250] sm:$0xf0] }
  0xe8   : > { %v1505_v20 = vpop.f32.mrf.mxu3  ;;  %v1517_v30 = vpop.f32.mrf.mxu1 }
  0xe9   : > { %v3890_v28 = vadd.f32 %v3755_v16, %v1505_v20  ;;  %v1518_v32 = vadd.f32 %v1517_v30, %v1429_v8  ;;  %v3343_v8 = vld [vmem:[%s3571_s21 + $0x220] sm:$0xf0]  ;;  %v2816_v20 = vor.u32 %v3339_v3, %v2813_v4  ;;  %v2847_v3 = vld [vmem:[%s3571_s21 + $0x240] sm:$0xf]  ;;  %v3350_v4 = vld [vmem:[%s3571_s21 + $0x258] sm:$0xf0] }
  0xea   : > { %v1784_v37 = vpop.f32.mrf.mxu0  ;;  %v2820_v30 = vor.u32 %v3343_v8, %v2819_v6 }
  0xeb   : > { %1556 = vmatmul.bf16.gmra.mxu1 %v2780_v21  ;;  %1645 = vmatmul.bf16.gmra.mxu2 %v2784_v22 }
  0xed   : > { %1734 = vmatmul.bf16.gmra.mxu3 %v2788_v31  ;;  %1823 = vmatmul.bf16.gmra.mxu0 %v2792_v36  ;;  %v1436_v36 = vadd.f32 %v3755_v16, %v3808_v61  ;;  %v1439_v61 = vadd.f32 %v3755_v16, %v3827_v17  ;;  %v1441_v17 = vadd.f32 %v3755_v16, %v3841_v26 }
  0xee   : > { %v1606_v38 = vpop.f32.mrf.mxu2 }
  0xef   : > { %v1607_v39 = vadd.f32 %v1606_v38, %v1518_v32 }
  0xf0   : > { %v1695_v40 = vpop.f32.mrf.mxu3  ;;  %v1519_v43 = vpop.f32.mrf.mxu1 }
  0xf1   : > { %v1520_v44 = vadd.f32 %v1519_v43, %v1431_v27  ;;  %v1696_v46 = vadd.f32 %v1695_v40, %v1607_v39 }
  0xf2   : > { %v1786_v48 = vpop.f32.mrf.mxu0 }
  0xf3   : > { %v3897_v51 = vadd.f32 %v1784_v37, %v1696_v46  ;;  %v3345_v46 = vld [vmem:[%s3571_s21 + $0x234] sm:$0xf] }
  0xf6   : > { %v1608_v5 = vpop.f32.mrf.mxu2 }
  0xf7   : > { %v1609_v9 = vadd.f32 %v1608_v5, %v1520_v44 }
  0xf8   : > { %v1697_v10 = vpop.f32.mrf.mxu3  ;;  %v1522_v15 = vpop.f32.mrf.mxu1 }
  0xf9   : > { %v1523_v21 = vadd.f32 %v1522_v15, %v1434_v63  ;;  %v1698_v22 = vadd.f32 %v1697_v10, %v1609_v9  ;;  %v2840_v9 = vor.u32 %v3349_v55, %v2839_v35  ;;  %v3353_v35 = vld [vmem:[%s3571_s21 + $0x274] sm:$0xf]  ;;  %v2869_v55 = vld [vmem:[%s3571_s21 + $0x28c] sm:$0xf0] }
  0xfa   : > { %v1789_v31 = vpop.f32.mrf.mxu0 }
  0xfb   : > { %v3909_v32 = vadd.f32 %v1786_v48, %v1698_v22  ;;  %1561 = vmatmul.bf16.gmra.mxu1 %v2808_v11  ;;  %1650 = vmatmul.bf16.gmra.mxu2 %v2812_v13  ;;  %v2833_v48 = vld [vmem:[%s3571_s21 + $0x24c] sm:$0xf0]  ;;  %v2844_v11 = vor.u32 %v3346_v57, %v2841_v62  ;;  %v2875_v57 = vld [vmem:[%s3571_s21 + $0x278] sm:$0xf]  ;;  %v3357_v62 = vld [vmem:[%s3571_s21 + $0x290] sm:$0xf0] }
  0xfc   : > { %v2836_v8 = vor.u32 %v3345_v46, %v2833_v48  ;;  %v3356_v46 = vld [vmem:[%s3571_s21 + $0x288] sm:$0xf0]  ;;  %v1444_v48 = vadd.f32 %v3755_v16, %v3860_v53 }
  0xfd   : > { %1739 = vmatmul.bf16.gmra.mxu3 %v2816_v20  ;;  %1828 = vmatmul.bf16.gmra.mxu0 %v2820_v30  ;;  %v2848_v20 = vor.u32 %v3350_v4, %v2847_v3  ;;  %v3441_v53 = vld [vmem:[%s4388_s3 + $0x28] sm:$0xff] }
  0xfe   : > { %v1611_v37 = vpop.f32.mrf.mxu2  ;;  %2160 = vmatpush.bf16.msra.mxu3 %v3441_v53 }
  0xff   : > { %v1612_v27 = vadd.f32 %v1611_v37, %v1523_v21 }
 0x100   : > { %v1700_v38 = vpop.f32.mrf.mxu3  ;;  %v1524_v39 = vpop.f32.mrf.mxu1 }
 0x101   : > { %v1525_v40 = vadd.f32 %v1524_v39, %v1436_v36  ;;  %v1701_v42 = vadd.f32 %v1700_v38, %v1612_v27  ;;  %v3428_v36 = vld [vmem:[%s4386_s1 + $0x148] sm:$0xff] }
 0x102   : > { %v1791_v43 = vpop.f32.mrf.mxu0  ;;  %1870 = vmatpush.bf16.msra.mxu1 %v3428_v36 }
 0x103   : > { %v3916_v44 = vadd.f32 %v1789_v31, %v1701_v42  ;;  %v2861_v42 = vld [vmem:[%s3571_s21 + $0x284] sm:$0xf0] }
 0x106   : > { %v1613_v63 = vpop.f32.mrf.mxu2 }
 0x107   : > { %v1614_v5 = vadd.f32 %v1613_v63, %v1525_v40  ;;  %v3352_v40 = vld [vmem:[%s3571_s21 + $0x26c] sm:$0xf] }
 0x108   : > { %v1702_v6 = vpop.f32.mrf.mxu3  ;;  %v1527_v10 = vpop.f32.mrf.mxu1  ;;  %v2864_v4 = vor.u32 %v3352_v40, %v2861_v42  ;;  %v2895_v40 = vld [vmem:[%s3571_s21 + $0x2a8] sm:$0xf]  ;;  %v3360_v42 = vld [vmem:[%s3571_s21 + $0x2ac] sm:$0xf] }
 0x109   : > { %v1528_v13 = vadd.f32 %v1527_v10, %v1439_v61  ;;  %v1703_v15 = vadd.f32 %v1702_v6, %v1614_v5 }
 0x10a   : > { %v1794_v21 = vpop.f32.mrf.mxu0 }
 0x10b   : > { %v3928_v22 = vadd.f32 %v1791_v43, %v1703_v15  ;;  %1566 = vmatmul.bf16.gmra.mxu1 %v2836_v8  ;;  %1655 = vmatmul.bf16.gmra.mxu2 %v2840_v9  ;;  %v2867_v43 = vld [vmem:[%s3571_s21 + $0x270] sm:$0xf]  ;;  %v2872_v8 = vor.u32 %v3353_v35, %v2869_v55  ;;  %v1446_v15 = vadd.f32 %v3755_v16, %v3874_v2  ;;  %v2897_v16 = vld [vmem:[%s3571_s21 + $0x2c4] sm:$0xf0] }
 0x10c   : > { %v2868_v5 = vor.u32 %v3356_v46, %v2867_v43  ;;  %v2903_v43 = vld [vmem:[%s3571_s21 + $0x2b0] sm:$0xf]  ;;  %v3364_v46 = vld [vmem:[%s3571_s21 + $0x2c8] sm:$0xf0] }
 0x10d   : > { %1744 = vmatmul.bf16.gmra.mxu3 %v2844_v11  ;;  %1833 = vmatmul.bf16.gmra.mxu0 %v2848_v20  ;;  %v2876_v11 = vor.u32 %v3357_v62, %v2875_v57 }
 0x10e   : > { %v1616_v30 = vpop.f32.mrf.mxu2 }
 0x10f   : > { %v1617_v31 = vadd.f32 %v1616_v30, %v1528_v13 }
 0x110   : > { %v1705_v54 = vpop.f32.mrf.mxu3  ;;  %v1529_v37 = vpop.f32.mrf.mxu1 }
 0x111   : > { %v1530_v27 = vadd.f32 %v1529_v37, %v1441_v17  ;;  %v1706_v38 = vadd.f32 %v1705_v54, %v1617_v31 }
 0x112   : > { %v1796_v26 = vpop.f32.mrf.mxu0 }
 0x113   : > { %v3935_v39 = vadd.f32 %v1794_v21, %v1706_v38  ;;  %v2889_v38 = vld [vmem:[%s3571_s21 + $0x2bc] sm:$0xf0] }
 0x116   : > { %v1618_v61 = vpop.f32.mrf.mxu2 }
 0x117   : > { %v1619_v63 = vadd.f32 %v1618_v61, %v1530_v27  ;;  %v3359_v27 = vld [vmem:[%s3571_s21 + $0x2a4] sm:$0xf] }
 0x118   : > { %v1707_v3 = vpop.f32.mrf.mxu3  ;;  %v1532_v6 = vpop.f32.mrf.mxu1  ;;  %v2892_v55 = vor.u32 %v3359_v27, %v2889_v38  ;;  %v2931_v27 = vld [vmem:[%s3571_s21 + $0x2e8] sm:$0xf]  ;;  %v3371_v38 = vld [vmem:[%s3571_s21 + $0x300] sm:$0xf0] }
 0x119   : > { %v1533_v9 = vadd.f32 %v1532_v6, %v1444_v48  ;;  %v1708_v10 = vadd.f32 %v1707_v3, %v1619_v63  ;;  %v2900_v63 = vor.u32 %v3360_v42, %v2897_v16 }
 0x11a   : > { %v1799_v21 = vpop.f32.mrf.mxu0 }
 0x11b   : > { %v3947_v13 = vadd.f32 %v1796_v26, %v1708_v10  ;;  %1571 = vmatmul.bf16.gmra.mxu1 %v2864_v4  ;;  %1660 = vmatmul.bf16.gmra.mxu2 %v2868_v5  ;;  %v3363_v26 = vld [vmem:[%s3571_s21 + $0x2c0] sm:$0xf0]  ;;  %v2904_v5 = vor.u32 %v3364_v46, %v2903_v43  ;;  %v2932_v46 = vor.u32 %v3371_v38, %v2931_v27 }
 0x11c   : > { %v2896_v61 = vor.u32 %v3363_v26, %v2895_v40 }
 0x11d   : > { %1749 = vmatmul.bf16.gmra.mxu3 %v2872_v8  ;;  %1838 = vmatmul.bf16.gmra.mxu0 %v2876_v11 }
 0x11e   : > { %v1621_v20 = vpop.f32.mrf.mxu2 }
 0x11f   : > { %v1622_v17 = vadd.f32 %v1621_v20, %v1533_v9  ;;  %v3366_v20 = vld [vmem:[%s3571_s21 + $0x2dc] sm:$0xf] }
 0x120   : > { %v1710_v30 = vpop.f32.mrf.mxu3  ;;  %v1534_v31 = vpop.f32.mrf.mxu1 }
 0x121   : > { %v1535_v54 = vadd.f32 %v1534_v31, %v1446_v15  ;;  %v1711_v36 = vadd.f32 %v1710_v30, %v1622_v17  ;;  %v2923_v17 = vld [vmem:[%s3571_s21 + $0x2e0] sm:$0xf]  ;;  %v3370_v30 = vld [vmem:[%s3571_s21 + $0x2f8] sm:$0xf0]  ;;  %v3367_v31 = vld [vmem:[%s3571_s21 + $0x2e4] sm:$0xf] }
 0x122   : > { %v1801_v62 = vpop.f32.mrf.mxu0  ;;  %v2924_v16 = vor.u32 %v3370_v30, %v2923_v17 }
 0x123   : > { %v3954_v37 = vadd.f32 %v1799_v21, %v1711_v36  ;;  %v2917_v21 = vld [vmem:[%s3571_s21 + $0x2f4] sm:$0xf0] }
 0x124   : > { %v2920_v42 = vor.u32 %v3366_v20, %v2917_v21 }
 0x126   : > { %v1623_v2 = vpop.f32.mrf.mxu2 }
 0x127   : > { %v1624_v48 = vadd.f32 %v1623_v2, %v1535_v54  ;;  %v2925_v54 = vld [vmem:[%s3571_s21 + $0x2fc] sm:$0xf0] }
 0x128   : > { %v1712_v35 = vpop.f32.mrf.mxu3  ;;  %v1537_v57 = vpop.f32.mrf.mxu1 }
 0x129   : > { %v1538_v3 = vadd.f32 %v1537_v57, %v3762_v25  ;;  %v1713_v4 = vadd.f32 %v1712_v35, %v1624_v48  ;;  %v3427_v25 = vld [vmem:[%s4386_s1 + $0x140] sm:$0xff] }
 0x12a   : > { %1871 = vmatpush.bf16.msra.mxu1 %v3427_v25  ;;  %v3440_v48 = vld [vmem:[%s4388_s3 + $0x20] sm:$0xff] }
 0x12b   : > { %v3965_v6 = vadd.f32 %v1801_v62, %v1713_v4  ;;  %1576 = vmatmul.bf16.gmra.mxu1 %v2892_v55  ;;  %1665 = vmatmul.bf16.gmra.mxu2 %v2896_v61  ;;  %v2951_v4 = vld [vmem:[%s3571_s21 + $0x318] sm:$0xf]  ;;  %v2959_v25 = vld [vmem:[%s3571_s21 + $0x320] sm:$0xf] }
 0x12c   : > { %2161 = vmatpush.bf16.msra.mxu3 %v3440_v48  ;;  %v3381_v48 = vld [vmem:[%s3571_s21 + $0x354] sm:$0xf] }
 0x12d   : > { %1754 = vmatmul.bf16.gmra.mxu3 %v2900_v63  ;;  %1843 = vmatmul.bf16.gmra.mxu0 %v2904_v5  ;;  %v3373_v63 = vld [vmem:[%s3571_s21 + $0x314] sm:$0xf] }
 0x12e   : > { %v1626_v8 = vpop.f32.mrf.mxu2  ;;  %v3377_v5 = vld [vmem:[%s3571_s21 + $0x330] sm:$0xf0] }
 0x12f   : > { %v1627_v9 = vadd.f32 %v1626_v8, %v1538_v3  ;;  %v2945_v3 = vld [vmem:[%s3571_s21 + $0x32c] sm:$0xf0]  ;;  %v3374_v8 = vld [vmem:[%s3571_s21 + $0x31c] sm:$0xf]  ;;  %v2952_v17 = vor.u32 %v3377_v5, %v2951_v4 }
 0x130   : > { %v1715_v10 = vpop.f32.mrf.mxu3  ;;  %v1539_v11 = vpop.f32.mrf.mxu1  ;;  %v2948_v21 = vor.u32 %v3373_v63, %v2945_v3 }
 0x131   : > { %v1540_v53 = vadd.f32 %v1539_v11, %v3776_v34  ;;  %v3971_v15 = vadd.f32 %v1715_v10, %v1627_v9  ;;  %v2928_v34 = vor.u32 %v3367_v31, %v2925_v54  ;;  %v2953_v9 = vld [vmem:[%s3571_s21 + $0x334] sm:$0xf0]  ;;  %v3378_v11 = vld [vmem:[%s3571_s21 + $0x338] sm:$0xf0] }
 0x132   : > { %v2956_v30 = vor.u32 %v3374_v8, %v2953_v9  ;;  %v2960_v54 = vor.u32 %v3378_v11, %v2959_v25 }
 0x136   : > { %v1628_v36 = vpop.f32.mrf.mxu2 }
 0x137   : > { %v3981_v40 = vadd.f32 %v1628_v36, %v1540_v53 }
 0x138   : > { %v3983_v26 = vpop.f32.mrf.mxu3  ;;  %v1542_v2 = vpop.f32.mrf.mxu1 }
 0x139   : > { %v1543_v43 = vadd.f32 %v1542_v2, %v3795_v52 }
 0x13b   : > { %1581 = vmatmul.bf16.gmra.mxu1 %v2920_v42  ;;  %1670 = vmatmul.bf16.gmra.mxu2 %v2924_v16 }
 0x13d   : > { %1759 = vmatmul.bf16.gmra.mxu3 %v2928_v34  ;;  %1848 = vmatmul.bf16.gmra.mxu0 %v2932_v46  ;;  %v3380_v34 = vld [vmem:[%s3571_s21 + $0x34c] sm:$0xf] }
 0x13e   : > { %v1631_v35 = vpop.f32.mrf.mxu2  ;;  %v3384_v46 = vld [vmem:[%s3571_s21 + $0x368] sm:$0xf0] }
 0x13f   : > { %v1632_v55 = vadd.f32 %v1631_v35, %v1543_v43  ;;  %v2973_v43 = vld [vmem:[%s3571_s21 + $0x364] sm:$0xf0]  ;;  %v2981_v35 = vld [vmem:[%s3571_s21 + $0x36c] sm:$0xf0] }
 0x140   : > { %v1720_v61 = vpop.f32.mrf.mxu3  ;;  %v1544_v52 = vpop.f32.mrf.mxu1  ;;  %v2976_v3 = vor.u32 %v3380_v34, %v2973_v43 }
 0x141   : > { %v1545_v57 = vadd.f32 %v1544_v52, %v3806_v60  ;;  %v3990_v62 = vadd.f32 %v1720_v61, %v1632_v55  ;;  %v2987_v61 = vld [vmem:[%s3571_s21 + $0x358] sm:$0xf]  ;;  %v3385_v52 = vld [vmem:[%s3571_s21 + $0x370] sm:$0xf0] }
 0x142   : > { %v2988_v9 = vor.u32 %v3385_v52, %v2987_v61 }
 0x146   : > { %v1633_v10 = vpop.f32.mrf.mxu2 }
 0x147   : > { %v4000_v53 = vadd.f32 %v1633_v10, %v1545_v57  ;;  %v3439_v10 = vld [vmem:[%s4388_s3 + $0x18] sm:$0xff] }
 0x148   : > { %v4002_v20 = vpop.f32.mrf.mxu3  ;;  %v1547_v60 = vpop.f32.mrf.mxu1  ;;  %2162 = vmatpush.bf16.msra.mxu3 %v3439_v10 }
 0x149   : > { %v1548_v31 = vadd.f32 %v1547_v60, %v3825_v14  ;;  %v2979_v14 = vld [vmem:[%s3571_s21 + $0x350] sm:$0xf] }
 0x14a   : > { %v2980_v4 = vor.u32 %v3384_v46, %v2979_v14 }
 0x14b   : > { %1586 = vmatmul.bf16.gmra.mxu1 %v2948_v21  ;;  %1675 = vmatmul.bf16.gmra.mxu2 %v2952_v17 }
 0x14d   : > { %1764 = vmatmul.bf16.gmra.mxu3 %v2956_v30  ;;  %1853 = vmatmul.bf16.gmra.mxu0 %v2960_v54  ;;  %v2575_v54 = vld [vmem:[%s3571_s21 + $0x18] sm:$0xf] }
 0x14e   : > { %v1636_v36 = vpop.f32.mrf.mxu2 }
 0x14f   : > { %v1637_v27 = vadd.f32 %v1636_v36, %v1548_v31  ;;  %v2569_v31 = vld [vmem:[%s3571_s21 + $0x2c] sm:$0xf0]  ;;  %v3281_v36 = vld [vmem:[%s3571_s21 + $0x30] sm:$0xf0] }
 0x150   : > { %v1725_v38 = vpop.f32.mrf.mxu3  ;;  %v1549_v42 = vpop.f32.mrf.mxu1  ;;  %v2576_v34 = vor.u32 %v3281_v36, %v2575_v54 }
 0x151   : > { %v1550_v16 = vadd.f32 %v1549_v42, %v3839_v24  ;;  %v4006_v2 = vadd.f32 %v1725_v38, %v1637_v27  ;;  %v2984_v24 = vor.u32 %v3381_v48, %v2981_v35  ;;  %v3451_v35 = vld [vmem:[%s4390_s5 + $0x38] sm:$0xff] }
 0x152   : > { %2363 = vmatpush.bf16.msra.mxu0 %v3451_v35 }
 0x156   : > { %v1638_v55 = vpop.f32.mrf.mxu2 }
 0x157   : > { %v4016_v57 = vadd.f32 %v1638_v55, %v1550_v16 }
 0x158   : > { %v4018_v63 = vpop.f32.mrf.mxu3  ;;  %v1552_v5 = vpop.f32.mrf.mxu1 }
 0x159   : > { %v1553_v8 = vadd.f32 %v1552_v5, %v3858_v49  ;;  %v3277_v49 = vld [vmem:[%s3571_s21 + $0x14] sm:$0xf]  ;;  %v2603_v5 = vld [vmem:[%s3571_s21 + $0x50] sm:$0xf] }
 0x15a   : > { %v2572_v16 = vor.u32 %v3277_v49, %v2569_v31 }
 0x15b   : > { %1591 = vmatmul.bf16.gmra.mxu1 %v2976_v3  ;;  %1680 = vmatmul.bf16.gmra.mxu2 %v2980_v4  ;;  %v3284_v3 = vld [vmem:[%s3571_s21 + $0x4c] sm:$0xf]  ;;  %v2597_v4 = vld [vmem:[%s3571_s21 + $0x64] sm:$0xf0] }
 0x15c   : > { %v2600_v10 = vor.u32 %v3284_v3, %v2597_v4  ;;  %v3450_v4 = vld [vmem:[%s4390_s5 + $0x30] sm:$0xff] }
 0x15d   : > { %1769 = vmatmul.bf16.gmra.mxu3 %v2984_v24  ;;  %1858 = vmatmul.bf16.gmra.mxu0 %v2988_v9 }
 0x15e   : > { %v1641_v25 = vpop.f32.mrf.mxu2  ;;  %2364 = vmatpush.bf16.msra.mxu0 %v3450_v4 }
 0x15f   : > { %v1642_v11 = vadd.f32 %v1641_v25, %v1553_v8 }
 0x160   : > { %v1730_v21 = vpop.f32.mrf.mxu3  ;;  %v1554_v17 = vpop.f32.mrf.mxu1 }
 0x161   : > { %v1555_v60 = vadd.f32 %v1554_v17, %v3872_v1  ;;  %v4025_v30 = vadd.f32 %v1730_v21, %v1642_v11  ;;  %v3438_v21 = vld [vmem:[%s4388_s3 + $0x10] sm:$0xff] }
 0x162   : > { %2163 = vmatpush.bf16.msra.mxu3 %v3438_v21 }
 0x166   : > { %v1643_v27 = vpop.f32.mrf.mxu2 }
 0x167   : > { %v4031_v38 = vadd.f32 %v1643_v27, %v1555_v60  ;;  %v3291_v27 = vld [vmem:[%s3571_s21 + $0x84] sm:$0xf] }
 0x168   : > { %v4033_v42 = vpop.f32.mrf.mxu3  ;;  %v1557_v43 = vpop.f32.mrf.mxu1 }
 0x169   : > { %v1558_v1 = vadd.f32 %v1557_v43, %v3767_v29  ;;  %v3288_v29 = vld [vmem:[%s3571_s21 + $0x68] sm:$0xf0] }
 0x16a   : > { %v2604_v25 = vor.u32 %v3288_v29, %v2603_v5 }
 0x16b   : > { %1872 = vmatmul.bf16.vlgmr.msra.gmra.mxu1 %v2572_v16  ;;  %3193 = vmatmul.msk.bf16.vlgmr.msra.gmra.mxu2 %vm1370_vm0, %v2576_v34  ;;  %v2625_v16 = vld [vmem:[%s3571_s21 + $0x9c] sm:$0xf0]  ;;  %v2631_v34 = vld [vmem:[%s3571_s21 + $0x88] sm:$0xf] }
 0x16e   : > { %v1646_v14 = vpop.f32.mrf.mxu2 }
 0x16f   : > { %v1647_v46 = vadd.f32 %v1646_v14, %v1558_v1 }
 0x170   : > { %v1735_v48 = vpop.f32.mrf.mxu3  ;;  %v1559_v55 = vpop.f32.mrf.mxu1 }
 0x171   : > { %v1560_v61 = vadd.f32 %v1559_v55, %v3789_v45  ;;  %v4041_v52 = vadd.f32 %v1735_v48, %v1647_v46  ;;  %v2628_v46 = vor.u32 %v3291_v27, %v2625_v16 }
 0x176   : > { %v1648_v24 = vpop.f32.mrf.mxu2 }
 0x177   : > { %v4047_v8 = vadd.f32 %v1648_v24, %v1560_v61 }
 0x178   : > { %v4049_v9 = vpop.f32.mrf.mxu3  ;;  %v1562_v11 = vpop.f32.mrf.mxu1 }
 0x179   : > { %v1563_v45 = vadd.f32 %v1562_v11, %v3800_v56  ;;  %v3295_v56 = vld [vmem:[%s3571_s21 + $0xa0] sm:$0xf0]  ;;  %v2659_v11 = vld [vmem:[%s3571_s21 + $0xc0] sm:$0xf] }
 0x17a   : > { %v2632_v48 = vor.u32 %v3295_v56, %v2631_v34 }
 0x17b   : > { %1877 = vmatmul.bf16.gmra.mxu1 %v2600_v10  ;;  %3194 = vmatmul.msk.bf16.gmra.mxu2 %vm1370_vm0, %v2604_v25  ;;  %v3298_v10 = vld [vmem:[%s3571_s21 + $0xbc] sm:$0xf]  ;;  %v2653_v25 = vld [vmem:[%s3571_s21 + $0xd4] sm:$0xf0] }
 0x17e   : > { %v1651_v17 = vpop.f32.mrf.mxu2 }
 0x17f   : > { %v1652_v60 = vadd.f32 %v1651_v17, %v1563_v45 }
 0x180   : > { %v1740_v49 = vpop.f32.mrf.mxu3  ;;  %v1564_v31 = vpop.f32.mrf.mxu1 }
 0x181   : > { %v1565_v54 = vadd.f32 %v1564_v31, %v3819_v7  ;;  %v4057_v36 = vadd.f32 %v1740_v49, %v1652_v60  ;;  %v2656_v60 = vor.u32 %v3298_v10, %v2653_v25 }
 0x186   : > { %v1653_v43 = vpop.f32.mrf.mxu2 }
 0x187   : > { %v4063_v1 = vadd.f32 %v1653_v43, %v1565_v54  ;;  %v3437_v54 = vld [vmem:[%s4388_s3 + $0x8] sm:$0xff] }
 0x188   : > { %v4065_v14 = vpop.f32.mrf.mxu3  ;;  %v1567_v35 = vpop.f32.mrf.mxu1  ;;  %2164 = vmatpush.bf16.msra.mxu3 %v3437_v54  ;;  %v2715_v54 = vld [vmem:[%s3571_s21 + $0x130] sm:$0xf] }
 0x189   : > { %v1568_v7 = vadd.f32 %v1567_v35, %v3830_v19  ;;  %v3302_v19 = vld [vmem:[%s3571_s21 + $0xd8] sm:$0xf0]  ;;  %v2681_v35 = vld [vmem:[%s3571_s21 + $0x10c] sm:$0xf0] }
 0x18a   : > { %v2660_v49 = vor.u32 %v3302_v19, %v2659_v11  ;;  %v3449_v19 = vld [vmem:[%s4390_s5 + $0x28] sm:$0xff] }
 0x18b   : > { %1882 = vmatmul.bf16.gmra.mxu1 %v2628_v46  ;;  %3195 = vmatmul.msk.bf16.gmra.mxu2 %vm1370_vm0, %v2632_v48  ;;  %v3305_v48 = vld [vmem:[%s3571_s21 + $0xf4] sm:$0xf] }
 0x18c   : > { %v2684_v4 = vor.u32 %v3305_v48, %v2681_v35  ;;  %2365 = vmatpush.bf16.msra.mxu0 %v3449_v19  ;;  %v3436_v35 = vld [vmem:[%s4388_s3] sm:$0xff] }
 0x18d   : > { %2165 = vmatpush.bf16.msra.mxu3 %v3436_v35  ;;  %v3326_v35 = vld [vmem:[%s3571_s21 + $0x19c] sm:$0xf] }
 0x18e   : > { %v1656_v55 = vpop.f32.mrf.mxu2 }
 0x18f   : > { %v1657_v61 = vadd.f32 %v1656_v55, %v1568_v7  ;;  %v2687_v7 = vld [vmem:[%s3571_s21 + $0xf8] sm:$0xf] }
 0x190   : > { %v1745_v3 = vpop.f32.mrf.mxu3  ;;  %v1569_v5 = vpop.f32.mrf.mxu1 }
 0x191   : > { %v1570_v29 = vadd.f32 %v1569_v5, %v3852_v41  ;;  %v4073_v24 = vadd.f32 %v1745_v3, %v1657_v61 }
 0x196   : > { %v1658_v45 = vpop.f32.mrf.mxu2 }
 0x197   : > { %v4079_v21 = vadd.f32 %v1658_v45, %v1570_v29 }
 0x198   : > { %v4081_v17 = vpop.f32.mrf.mxu3  ;;  %v1572_v31 = vpop.f32.mrf.mxu1 }
 0x199   : > { %v1573_v41 = vadd.f32 %v1572_v31, %v3866_v58  ;;  %v3309_v58 = vld [vmem:[%s3571_s21 + $0x110] sm:$0xf0]  ;;  %v3312_v31 = vld [vmem:[%s3571_s21 + $0x12c] sm:$0xf] }
 0x19a   : > { %v2688_v5 = vor.u32 %v3309_v58, %v2687_v7 }
 0x19b   : > { %1887 = vmatmul.bf16.gmra.mxu1 %v2656_v60  ;;  %3196 = vmatmul.msk.bf16.gmra.mxu2 %vm1370_vm0, %v2660_v49 }
 0x19e   : > { %v1661_v27 = vpop.f32.mrf.mxu2 }
 0x19f   : > { %v1662_v16 = vadd.f32 %v1661_v27, %v1573_v41  ;;  %v2709_v41 = vld [vmem:[%s3571_s21 + $0x144] sm:$0xf0] }
 0x1a0   : > { %v1750_v34 = vpop.f32.mrf.mxu3  ;;  %v1574_v56 = vpop.f32.mrf.mxu1 }
 0x1a1   : > { %v1575_v43 = vadd.f32 %v1574_v56, %v3887_v18  ;;  %v4089_v46 = vadd.f32 %v1750_v34, %v1662_v16  ;;  %v2712_v56 = vor.u32 %v3312_v31, %v2709_v41 }
 0x1a6   : > { %v1663_v55 = vpop.f32.mrf.mxu2 }
 0x1a7   : > { %v4095_v61 = vadd.f32 %v1663_v55, %v1575_v43 }
 0x1a8   : > { %v4097_v3 = vpop.f32.mrf.mxu3  ;;  %v1577_v29 = vpop.f32.mrf.mxu1 }
 0x1a9   : > { %v1578_v18 = vadd.f32 %v1577_v29, %v3773_v33  ;;  %v3316_v33 = vld [vmem:[%s3571_s21 + $0x148] sm:$0xf0] }
 0x1aa   : > { %v2716_v43 = vor.u32 %v3316_v33, %v2715_v54 }
 0x1ab   : > { %1892 = vmatmul.bf16.gmra.mxu1 %v2684_v4  ;;  %3197 = vmatmul.msk.bf16.gmra.mxu2 %vm1370_vm0, %v2688_v5 }
 0x1ae   : > { %v1666_v10 = vpop.f32.mrf.mxu2 }
 0x1af   : > { %v1667_v25 = vadd.f32 %v1666_v10, %v1578_v18  ;;  %v3319_v18 = vld [vmem:[%s3571_s21 + $0x164] sm:$0xf]  ;;  %v2737_v10 = vld [vmem:[%s3571_s21 + $0x17c] sm:$0xf0] }
 0x1b0   : > { %v1755_v11 = vpop.f32.mrf.mxu3  ;;  %v1579_v45 = vpop.f32.mrf.mxu1 }
 0x1b1   : > { %v1580_v60 = vadd.f32 %v1579_v45, %v3792_v50  ;;  %v4105_v49 = vadd.f32 %v1755_v11, %v1667_v25  ;;  %v2743_v25 = vld [vmem:[%s3571_s21 + $0x168] sm:$0xf] }
 0x1b6   : > { %v1668_v27 = vpop.f32.mrf.mxu2 }
 0x1b7   : > { %v4111_v16 = vadd.f32 %v1668_v27, %v1580_v60  ;;  %v2740_v60 = vor.u32 %v3319_v18, %v2737_v10 }
 0x1b8   : > { %v4113_v34 = vpop.f32.mrf.mxu3  ;;  %v1582_v48 = vpop.f32.mrf.mxu1 }
 0x1b9   : > { %v1583_v50 = vadd.f32 %v1582_v48, %v3803_v59  ;;  %v3323_v59 = vld [vmem:[%s3571_s21 + $0x180] sm:$0xf0] }
 0x1ba   : > { %v2744_v31 = vor.u32 %v3323_v59, %v2743_v25 }
 0x1bb   : > { %1897 = vmatmul.bf16.gmra.mxu1 %v2712_v56  ;;  %3198 = vmatmul.msk.bf16.gmra.mxu2 %vm1370_vm0, %v2716_v43 }
 0x1be   : > { %v1671_v7 = vpop.f32.mrf.mxu2 }
 0x1bf   : > { %v1672_v58 = vadd.f32 %v1671_v7, %v1583_v50  ;;  %v3448_v50 = vld [vmem:[%s4390_s5 + $0x20] sm:$0xff]  ;;  %v2765_v7 = vld [vmem:[%s3571_s21 + $0x1b4] sm:$0xf0] }
 0x1c0   : > { %v1760_v55 = vpop.f32.mrf.mxu3  ;;  %v1584_v4 = vpop.f32.mrf.mxu1  ;;  %2366 = vmatpush.bf16.msra.mxu0 %v3448_v50 }
 0x1c1   : > { %v1585_v5 = vadd.f32 %v1584_v4, %v3822_v12  ;;  %v4121_v29 = vadd.f32 %v1760_v55, %v1672_v58  ;;  %v2771_v58 = vld [vmem:[%s3571_s21 + $0x1a0] sm:$0xf] }
 0x1c6   : > { %v1673_v11 = vpop.f32.mrf.mxu2 }
 0x1c7   : > { %v4127_v19 = vadd.f32 %v1673_v11, %v1585_v5 }
 0x1c8   : > { %v4129_v45 = vpop.f32.mrf.mxu3  ;;  %v1587_v41 = vpop.f32.mrf.mxu1 }
 0x1c9   : > { %v1588_v12 = vadd.f32 %v1587_v41, %v3836_v23  ;;  %v3330_v23 = vld [vmem:[%s3571_s21 + $0x1b8] sm:$0xf0] }
 0x1ca   : > { %v2772_v18 = vor.u32 %v3330_v23, %v2771_v58  ;;  %v3447_v23 = vld [vmem:[%s4390_s5 + $0x18] sm:$0xff] }
 0x1cb   : > { %1902 = vmatmul.bf16.gmra.mxu1 %v2740_v60  ;;  %3199 = vmatmul.msk.bf16.gmra.mxu2 %vm1370_vm0, %v2744_v31 }
 0x1cc   : > { %2367 = vmatpush.bf16.msra.mxu0 %v3447_v23  ;;  %v2855_v23 = vld [vmem:[%s3571_s21 + $0x248] sm:$0xf] }
 0x1ce   : > { %v1676_v54 = vpop.f32.mrf.mxu2 }
 0x1cf   : > { %v1677_v33 = vadd.f32 %v1676_v54, %v1588_v12  ;;  %v3333_v54 = vld [vmem:[%s3571_s21 + $0x1d4] sm:$0xf] }
 0x1d0   : > { %v1765_v27 = vpop.f32.mrf.mxu3  ;;  %v1589_v56 = vpop.f32.mrf.mxu1 }
 0x1d1   : > { %v1590_v43 = vadd.f32 %v1589_v56, %v3855_v47  ;;  %v4134_v48 = vadd.f32 %v1765_v27, %v1677_v33  ;;  %v2768_v47 = vor.u32 %v3326_v35, %v2765_v7  ;;  %v2793_v33 = vld [vmem:[%s3571_s21 + $0x1ec] sm:$0xf0]  ;;  %v2799_v27 = vld [vmem:[%s3571_s21 + $0x1d8] sm:$0xf]  ;;  %v3337_v56 = vld [vmem:[%s3571_s21 + $0x1f0] sm:$0xf0] }
 0x1d2   : > { %v2796_v50 = vor.u32 %v3333_v54, %v2793_v33  ;;  %v2800_v35 = vor.u32 %v3337_v56, %v2799_v27  ;;  %v4168_v27 = vpop.f32.mrf.mxu0 }
 0x1d6   : > { %v1678_v55 = vpop.f32.mrf.mxu2 }
 0x1d7   : > { %v4143_v4 = vadd.f32 %v1678_v55, %v1590_v43 }
 0x1d8   : > { %v4145_v5 = vpop.f32.mrf.mxu3  ;;  %v1592_v10 = vpop.f32.mrf.mxu1 }
 0x1d9   : > { %v1593_v25 = vadd.f32 %v1592_v10, %v3869_v0  ;;  %v2827_v10 = vld [vmem:[%s3571_s21 + $0x210] sm:$0xf] }
 0x1db   : > { %1907 = vmatmul.bf16.gmra.mxu1 %v2768_v47  ;;  %3200 = vmatmul.msk.bf16.gmra.mxu2 %vm1370_vm0, %v2772_v18  ;;  %v3340_v47 = vld [vmem:[%s3571_s21 + $0x20c] sm:$0xf]  ;;  %v2821_v18 = vld [vmem:[%s3571_s21 + $0x224] sm:$0xf0] }
 0x1de   : > { %v1681_v59 = vpop.f32.mrf.mxu2 }
 0x1df   : > { %v1682_v11 = vadd.f32 %v1681_v59, %v1593_v25  ;;  %v3344_v25 = vld [vmem:[%s3571_s21 + $0x228] sm:$0xf0] }
 0x1e0   : > { %v1770_v60 = vpop.f32.mrf.mxu3  ;;  %v1594_v31 = vpop.f32.mrf.mxu1  ;;  %v2828_v54 = vor.u32 %v3344_v25, %v2827_v10 }
 0x1e1   : > { %v1595_v41 = vadd.f32 %v1594_v31, %v3890_v28  ;;  %v4150_v12 = vadd.f32 %v1770_v60, %v1682_v11 }
 0x1e6   : > { %v1683_v0 = vpop.f32.mrf.mxu2 }
 0x1e7   : > { %v4156_v43 = vadd.f32 %v1683_v0, %v1595_v41  ;;  %v2824_v41 = vor.u32 %v3340_v47, %v2821_v18 }
 0x1e8   : > { %v1873_v7 = vpop.f32.mrf.mxu1 }
 0x1e9   : > { %v1874_v55 = vadd.f32 %v1873_v7, %v3897_v51 }
 0x1eb   : > { %1912 = vmatmul.bf16.gmra.mxu1 %v2796_v50  ;;  %3201 = vmatmul.msk.bf16.gmra.mxu2 %vm1370_vm0, %v2800_v35  ;;  %v4171_v35 = vpop.f32.mrf.mxu0 }
 0x1ee   : > { %v1962_v28 = vpop.f32.mrf.mxu2 }
 0x1ef   : > { %v1963_v59 = vadd.f32 %v1962_v28, %v1874_v55  ;;  %v3347_v28 = vld [vmem:[%s3571_s21 + $0x244] sm:$0xf] }
 0x1f0   : > { %v1875_v58 = vpop.f32.mrf.mxu1  ;;  %v3351_v55 = vld [vmem:[%s3571_s21 + $0x260] sm:$0xf0] }
 0x1f1   : > { %v1876_v11 = vadd.f32 %v1875_v58, %v3909_v32  ;;  %v2042_v51 = vmax.f32 %v1963_v59, 0.0  ;;  %v2849_v58 = vld [vmem:[%s3571_s21 + $0x25c] sm:$0xf0] }
 0x1f2   : > { %v2852_v59 = vor.u32 %v3347_v28, %v2849_v58 }
 0x1f6   : > { %v1964_v60 = vpop.f32.mrf.mxu2 }
 0x1f7   : > { %v1965_v31 = vadd.f32 %v1964_v60, %v1876_v11  ;;  %v2856_v11 = vor.u32 %v3351_v55, %v2855_v23 }
 0x1f8   : > { %v1878_v33 = vpop.f32.mrf.mxu1 }
 0x1f9   : > { %v2043_v56 = vmax.f32 %v1965_v31, 0.0  ;;  %v1879_v7 = vadd.f32 %v1878_v33, %v3916_v44 }
 0x1fb   : > { %v2074_v0 = vpack.c.bf16 %v2043_v56, %v2042_v51  ;;  %1917 = vmatmul.bf16.gmra.mxu1 %v2824_v41  ;;  %3202 = vmatmul.msk.bf16.gmra.mxu2 %vm1370_vm0, %v2828_v54  ;;  %v4180_v54 = vpop.f32.mrf.mxu0  ;;  %v3446_v51 = vld [vmem:[%s4390_s5 + $0x10] sm:$0xff] }
 0x1fc   : > { %2368 = vmatpush.bf16.msra.mxu0 %v3446_v51  ;;  %v3365_v51 = vld [vmem:[%s3571_s21 + $0x2d0] sm:$0xf0] }
 0x1fd   : > { %2166 = vmatmul.bf16.vlgmr.msra.gmra.mxu3 %v2074_v0  ;;  %v3354_v0 = vld [vmem:[%s3571_s21 + $0x27c] sm:$0xf] }
 0x1fe   : > { %v1967_v50 = vpop.f32.mrf.mxu2 }
 0x1ff   : > { %v1968_v47 = vadd.f32 %v1967_v50, %v1879_v7  ;;  %v2877_v50 = vld [vmem:[%s3571_s21 + $0x294] sm:$0xf0]  ;;  %v3358_v7 = vld [vmem:[%s3571_s21 + $0x298] sm:$0xf0] }
 0x200   : > { %v1880_v32 = vpop.f32.mrf.mxu1 }
 0x201   : > { %v1881_v18 = vadd.f32 %v1880_v32, %v3928_v22  ;;  %v2044_v31 = vmax.f32 %v1968_v47, 0.0  ;;  %v2883_v32 = vld [vmem:[%s3571_s21 + $0x280] sm:$0xf] }
 0x203   : > { %v4191_v55 = vpop.f32.mrf.mxu0 }
 0x206   : > { %v1969_v10 = vpop.f32.mrf.mxu2 }
 0x207   : > { %v1970_v25 = vadd.f32 %v1969_v10, %v1881_v18  ;;  %v2880_v18 = vor.u32 %v3354_v0, %v2877_v50  ;;  %v2884_v10 = vor.u32 %v3358_v7, %v2883_v32 }
 0x208   : > { %v1883_v60 = vpop.f32.mrf.mxu1 }
 0x209   : > { %v2045_v41 = vmax.f32 %v1970_v25, 0.0  ;;  %v1884_v56 = vadd.f32 %v1883_v60, %v3935_v39 }
 0x20b   : > { %1922 = vmatmul.bf16.gmra.mxu1 %v2852_v59  ;;  %3203 = vmatmul.msk.bf16.gmra.mxu2 %vm1370_vm0, %v2856_v11  ;;  %v2075_v44 = vpack.c.bf16 %v2045_v41, %v2044_v31  ;;  %v4194_v31 = vpop.f32.mrf.mxu0 }
 0x20d   : > { %2171 = vmatmul.bf16.gmra.mxu3 %v2075_v44  ;;  %v3361_v44 = vld [vmem:[%s3571_s21 + $0x2b4] sm:$0xf] }
 0x20e   : > { %v1972_v33 = vpop.f32.mrf.mxu2 }
 0x20f   : > { %v1973_v28 = vadd.f32 %v1972_v33, %v1884_v56  ;;  %v2905_v33 = vld [vmem:[%s3571_s21 + $0x2cc] sm:$0xf0] }
 0x210   : > { %v1885_v22 = vpop.f32.mrf.mxu1  ;;  %v2908_v7 = vor.u32 %v3361_v44, %v2905_v33  ;;  %v2939_v44 = vld [vmem:[%s3571_s21 + $0x2f0] sm:$0xf]  ;;  %v3372_v33 = vld [vmem:[%s3571_s21 + $0x308] sm:$0xf0] }
 0x211   : > { %v1886_v58 = vadd.f32 %v1885_v22, %v3947_v13  ;;  %v2046_v39 = vmax.f32 %v1973_v28, 0.0  ;;  %v2911_v22 = vld [vmem:[%s3571_s21 + $0x2b8] sm:$0xf] }
 0x212   : > { %v2912_v28 = vor.u32 %v3365_v51, %v2911_v22 }
 0x216   : > { %v1974_v23 = vpop.f32.mrf.mxu2 }
 0x217   : > { %v1975_v47 = vadd.f32 %v1974_v23, %v1886_v58 }
 0x218   : > { %v1888_v25 = vpop.f32.mrf.mxu1 }
 0x219   : > { %v2047_v59 = vmax.f32 %v1975_v47, 0.0  ;;  %v1889_v41 = vadd.f32 %v1888_v25, %v3954_v37 }
 0x21b   : > { %1927 = vmatmul.bf16.gmra.mxu1 %v2880_v18  ;;  %3204 = vmatmul.msk.bf16.gmra.mxu2 %vm1370_vm0, %v2884_v10  ;;  %v2076_v11 = vpack.c.bf16 %v2047_v59, %v2046_v39  ;;  %v1816_v18 = vpop.f32.mrf.mxu0  ;;  %v1805_v39 = vadd.f32 %v4168_v27, %v3971_v15  ;;  %v3445_v59 = vld [vmem:[%s4390_s5 + $0x8] sm:$0xff]  ;;  %v2940_v15 = vor.u32 %v3372_v33, %v2939_v44 }
 0x21c   : > { %2369 = vmatpush.bf16.msra.mxu0 %v3445_v59  ;;  %v3379_v59 = vld [vmem:[%s3571_s21 + $0x340] sm:$0xf0] }
 0x21d   : > { %2176 = vmatmul.bf16.gmra.mxu3 %v2076_v11 }
 0x21e   : > { %v1977_v60 = vpop.f32.mrf.mxu2 }
 0x21f   : > { %v1978_v56 = vadd.f32 %v1977_v60, %v1889_v41  ;;  %v2933_v41 = vld [vmem:[%s3571_s21 + $0x304] sm:$0xf0] }
 0x220   : > { %v1890_v13 = vpop.f32.mrf.mxu1 }
 0x221   : > { %v1891_v0 = vadd.f32 %v1890_v13, %v3965_v6  ;;  %v2048_v23 = vmax.f32 %v1978_v56, 0.0  ;;  %v1718_v6 = vadd.f32 %v3983_v26, %v3981_v40  ;;  %v3368_v13 = vld [vmem:[%s3571_s21 + $0x2ec] sm:$0xf] }
 0x223   : > { %v1807_v11 = vadd.f32 %v4171_v35, %v1718_v6  ;;  %v4215_v22 = vpop.f32.mrf.mxu0  ;;  %v3375_v6 = vld [vmem:[%s3571_s21 + $0x324] sm:$0xf] }
 0x226   : > { %v1979_v50 = vpop.f32.mrf.mxu2 }
 0x227   : > { %v1980_v32 = vadd.f32 %v1979_v50, %v1891_v0  ;;  %v2936_v0 = vor.u32 %v3368_v13, %v2933_v41 }
 0x228   : > { %v1893_v58 = vpop.f32.mrf.mxu1 }
 0x229   : > { %v2049_v47 = vmax.f32 %v1980_v32, 0.0  ;;  %v1894_v60 = vadd.f32 %v1893_v58, %v1805_v39  ;;  %v2967_v39 = vld [vmem:[%s3571_s21 + $0x328] sm:$0xf] }
 0x22a   : > { %v2968_v33 = vor.u32 %v3379_v59, %v2967_v39  ;;  %v1733_v59 = vadd.f32 %v4033_v42, %v4031_v38  ;;  %v1738_v38 = vadd.f32 %v4049_v9, %v4047_v8  ;;  %v1743_v8 = vadd.f32 %v4065_v14, %v4063_v1 }
 0x22b   : > { %1932 = vmatmul.bf16.gmra.mxu1 %v2908_v7  ;;  %3205 = vmatmul.msk.bf16.gmra.mxu2 %vm1370_vm0, %v2912_v28  ;;  %v2077_v37 = vpack.c.bf16 %v2049_v47, %v2048_v23  ;;  %v1723_v28 = vadd.f32 %v4002_v20, %v4000_v53  ;;  %v1821_v58 = vpop.f32.mrf.mxu0  ;;  %v1810_v47 = vadd.f32 %v4180_v54, %v3990_v62 }
 0x22d   : > { %2181 = vmatmul.bf16.gmra.mxu3 %v2077_v37  ;;  %v1812_v37 = vadd.f32 %v4191_v55, %v1723_v28  ;;  %v1728_v55 = vadd.f32 %v4018_v63, %v4016_v57  ;;  %v3386_v28 = vld [vmem:[%s3571_s21 + $0x378] sm:$0xf0] }
 0x22e   : > { %v1982_v10 = vpop.f32.mrf.mxu2 }
 0x22f   : > { %v1983_v51 = vadd.f32 %v1982_v10, %v1894_v60 }
 0x230   : > { %v1895_v25 = vpop.f32.mrf.mxu1 }
 0x231   : > { %v1896_v40 = vadd.f32 %v1895_v25, %v1807_v11  ;;  %v2050_v50 = vmax.f32 %v1983_v51, 0.0  ;;  %v2961_v25 = vld [vmem:[%s3571_s21 + $0x33c] sm:$0xf0] }
 0x232   : > { %v2964_v44 = vor.u32 %v3375_v6, %v2961_v25 }
 0x233   : > { %v1824_v53 = vpop.f32.mrf.mxu0 }
 0x236   : > { %v1984_v26 = vpop.f32.mrf.mxu2 }
 0x237   : > { %v1985_v56 = vadd.f32 %v1984_v26, %v1896_v40 }
 0x238   : > { %v1898_v27 = vpop.f32.mrf.mxu1 }
 0x239   : > { %v2051_v35 = vmax.f32 %v1985_v56, 0.0  ;;  %v1899_v10 = vadd.f32 %v1898_v27, %v1810_v47  ;;  %v1815_v56 = vadd.f32 %v4194_v31, %v4006_v2 }
 0x23b   : > { %v2078_v32 = vpack.c.bf16 %v2051_v35, %v2050_v50  ;;  %1937 = vmatmul.bf16.gmra.mxu1 %v2936_v0  ;;  %3206 = vmatmul.msk.bf16.gmra.mxu2 %vm1370_vm0, %v2940_v15  ;;  %v3444_v0 = vld [vmem:[%s4390_s5] sm:$0xff]  ;;  %v1817_v15 = vadd.f32 %v1816_v18, %v1728_v55  ;;  %v1826_v27 = vpop.f32.mrf.mxu0  ;;  %v3382_v35 = vld [vmem:[%s3571_s21 + $0x35c] sm:$0xf] }
 0x23c   : > { %2370 = vmatpush.bf16.msra.mxu0 %v3444_v0  ;;  %v1825_v0 = vadd.f32 %v1824_v53, %v4041_v52 }
 0x23d   : > { %2186 = vmatmul.bf16.gmra.mxu3 %v2078_v32  ;;  %v2989_v32 = vld [vmem:[%s3571_s21 + $0x374] sm:$0xf0] }
 0x23e   : > { %v1987_v7 = vpop.f32.mrf.mxu2  ;;  %v2992_v63 = vor.u32 %v3382_v35, %v2989_v32 }
 0x23f   : > { %v1988_v11 = vadd.f32 %v1987_v7, %v1899_v10  ;;  %v2995_v7 = vld [vmem:[%s3571_s21 + $0x360] sm:$0xf] }
 0x240   : > { %v1900_v23 = vpop.f32.mrf.mxu1  ;;  %v2996_v10 = vor.u32 %v3386_v28, %v2995_v7  ;;  %v4247_v7 = vpop.f32.mrf.mxu3 }
 0x241   : > { %v1901_v60 = vadd.f32 %v1900_v23, %v1812_v37  ;;  %v2052_v20 = vmax.f32 %v1988_v11, 0.0 }
 0x243   : > { %v1829_v18 = vpop.f32.mrf.mxu0 }
 0x244   : > { %v1830_v53 = vadd.f32 %v1829_v18, %v4057_v36 }
 0x246   : > { %v1989_v13 = vpop.f32.mrf.mxu2 }
 0x247   : > { %v1990_v41 = vadd.f32 %v1989_v13, %v1901_v60  ;;  %v1820_v60 = vadd.f32 %v4215_v22, %v4025_v30  ;;  %v1822_v13 = vadd.f32 %v1821_v58, %v1733_v59  ;;  %v1827_v22 = vadd.f32 %v1826_v27, %v1738_v38 }
 0x248   : > { %v1903_v51 = vpop.f32.mrf.mxu1 }
 0x249   : > { %v2053_v40 = vmax.f32 %v1990_v41, 0.0  ;;  %v1904_v50 = vadd.f32 %v1903_v51, %v1815_v56 }
 0x24b   : > { %v2079_v62 = vpack.c.bf16 %v2053_v40, %v2052_v20  ;;  %1942 = vmatmul.bf16.gmra.mxu1 %v2964_v44  ;;  %3207 = vmatmul.msk.bf16.gmra.mxu2 %vm1370_vm0, %v2968_v33  ;;  %v1831_v20 = vpop.f32.mrf.mxu0 }
 0x24c   : > { %v1832_v27 = vadd.f32 %v1831_v20, %v1743_v8  ;;  %v1748_v20 = vadd.f32 %v4081_v17, %v4079_v21 }
 0x24d   : > { %2191 = vmatmul.bf16.gmra.mxu3 %v2079_v62 }
 0x24e   : > { %v1992_v54 = vpop.f32.mrf.mxu2 }
 0x24f   : > { %v1993_v23 = vadd.f32 %v1992_v54, %v1904_v50 }
 0x250   : > { %v1905_v26 = vpop.f32.mrf.mxu1 }
 0x251   : > { %v1906_v47 = vadd.f32 %v1905_v26, %v1817_v15  ;;  %v2054_v2 = vmax.f32 %v1993_v23, 0.0 }
 0x253   : > { %v1834_v30 = vpop.f32.mrf.mxu0 }
 0x256   : > { %v1994_v37 = vpop.f32.mrf.mxu2 }
 0x257   : > { %v1995_v57 = vadd.f32 %v1994_v37, %v1906_v47 }
 0x258   : > { %v1908_v6 = vpop.f32.mrf.mxu1 }
 0x259   : > { %v2055_v31 = vmax.f32 %v1995_v57, 0.0  ;;  %v1909_v41 = vadd.f32 %v1908_v6, %v1820_v60  ;;  %v4255_v6 = vld [vmem:[%s4389_s4] ss:$0 sm:$0xff] }
 0x25b   : > { %v2080_v25 = vpack.c.bf16 %v2055_v31, %v2054_v2  ;;  %1947 = vmatmul.bf16.gmra.mxu1 %v2992_v63  ;;  %3208 = vmatmul.msk.bf16.gmra.mxu2 %vm1370_vm0, %v2996_v10  ;;  %v1836_v37 = vpop.f32.mrf.mxu0 }
 0x25d   : > { %2196 = vmatmul.bf16.gmra.mxu3 %v2080_v25 }
 0x25e   : > { %v1997_v39 = vpop.f32.mrf.mxu2 }
 0x25f   : > { %v1998_v44 = vadd.f32 %v1997_v39, %v1909_v41 }
 0x260   : > { %v1910_v11 = vpop.f32.mrf.mxu1 }
 0x261   : > { %v1911_v33 = vadd.f32 %v1910_v11, %v1822_v13  ;;  %v2056_v54 = vmax.f32 %v1998_v44, 0.0 }
 0x263   : > { %v1839_v2 = vpop.f32.mrf.mxu0 }
 0x264   : > { %v1840_v8 = vadd.f32 %v1839_v2, %v4089_v46 }
 0x266   : > { %v1999_v51 = vpop.f32.mrf.mxu2 }
 0x267   : > { %v2000_v40 = vadd.f32 %v1999_v51, %v1911_v33 }
 0x268   : > { %v1913_v62 = vpop.f32.mrf.mxu1 }
 0x269   : > { %v2057_v55 = vmax.f32 %v2000_v40, 0.0  ;;  %v1914_v58 = vadd.f32 %v1913_v62, %v1825_v0 }
 0x26b   : > { %v2081_v26 = vpack.c.bf16 %v2057_v55, %v2056_v54  ;;  %v1841_v40 = vpop.f32.mrf.mxu0  ;;  %v1835_v55 = vadd.f32 %v1834_v30, %v4073_v24 }
 0x26d   : > { %2201 = vmatmul.bf16.gmra.mxu3 %v2081_v26  ;;  %v1837_v26 = vadd.f32 %v1836_v37, %v1748_v20  ;;  %v1753_v37 = vadd.f32 %v4097_v3, %v4095_v61 }
 0x26e   : > { %v2002_v56 = vpop.f32.mrf.mxu2 }
 0x26f   : > { %v2003_v15 = vadd.f32 %v2002_v56, %v1914_v58 }
 0x270   : > { %v1915_v42 = vpop.f32.mrf.mxu1 }
 0x271   : > { %v1916_v50 = vadd.f32 %v1915_v42, %v1827_v22  ;;  %v2058_v23 = vmax.f32 %v2003_v15, 0.0 }
 0x276   : > { %v2004_v35 = vpop.f32.mrf.mxu2 }
 0x277   : > { %v2005_v32 = vadd.f32 %v2004_v35, %v1916_v50  ;;  %v1844_v35 = vpop.f32.mrf.mxu0 }
 0x278   : > { %v1918_v28 = vpop.f32.mrf.mxu1 }
 0x279   : > { %v2059_v47 = vmax.f32 %v2005_v32, 0.0  ;;  %v1919_v10 = vadd.f32 %v1918_v28, %v1830_v53 }
 0x27b   : > { %v2082_v57 = vpack.c.bf16 %v2059_v47, %v2058_v23 }
 0x27d   : > { %2206 = vmatmul.bf16.gmra.mxu3 %v2082_v57 }
 0x27e   : > { %v2007_v63 = vpop.f32.mrf.mxu2 }
 0x27f   : > { %v2008_v31 = vadd.f32 %v2007_v63, %v1919_v10 }
 0x280   : > { %v1920_v52 = vpop.f32.mrf.mxu1  ;;  %v2167_v9 = vpop.f32.mrf.mxu3 }
 0x281   : > { %v1921_v25 = vadd.f32 %v1920_v52, %v1832_v27  ;;  %v2168_v59 = vadd.f32 %v4255_v6, %v2167_v9  ;;  %v2060_v14 = vmax.f32 %v2008_v31, 0.0  ;;  %v1842_v52 = vadd.f32 %v1841_v40, %v1753_v37  ;;  %v1846_v9 = vpop.f32.mrf.mxu0 }
 0x283   : > { %v2247_v18 = vmax.f32 %v2168_v59, 0.0 }
 0x286   : > { %v2009_v39 = vpop.f32.mrf.mxu2 }
 0x287   : > { %v2010_v11 = vadd.f32 %v2009_v39, %v1921_v25 }
 0x288   : > { %v1923_v60 = vpop.f32.mrf.mxu1  ;;  %v2169_v1 = vpop.f32.mrf.mxu3 }
 0x289   : > { %v2061_v13 = vmax.f32 %v2010_v11, 0.0  ;;  %v2170_v36 = vadd.f32 %v4255_v6, %v2169_v1  ;;  %v1924_v56 = vadd.f32 %v1923_v60, %v1835_v55 }
 0x28b   : > { %v2083_v41 = vpack.c.bf16 %v2061_v13, %v2060_v14  ;;  %v2248_v44 = vmax.f32 %v2170_v36, 0.0  ;;  %v1849_v36 = vpop.f32.mrf.mxu0 }
 0x28d   : > { %v2279_v33 = vpack.c.bf16 %v2248_v44, %v2247_v18  ;;  %2211 = vmatmul.bf16.gmra.mxu3 %v2083_v41  ;;  %v1758_v18 = vadd.f32 %v4113_v34, %v4111_v16 }
 0x28e   : > { %v2012_v51 = vpop.f32.mrf.mxu2 }
 0x28f   : > { %2371 = vmatmul.bf16.vlgmr.msra.gmra.mxu0 %v2279_v33  ;;  %v2013_v38 = vadd.f32 %v2012_v51, %v1924_v56  ;;  %v1845_v33 = vadd.f32 %v1844_v35, %v4105_v49  ;;  %v1847_v51 = vadd.f32 %v1846_v9, %v1758_v18  ;;  %v1763_v35 = vadd.f32 %v4129_v45, %v4127_v19 }
 0x290   : > { %v1925_v62 = vpop.f32.mrf.mxu1  ;;  %v2172_v54 = vpop.f32.mrf.mxu3 }
 0x291   : > { %v1926_v42 = vadd.f32 %v1925_v62, %v1837_v26  ;;  %v2173_v22 = vadd.f32 %v4255_v6, %v2172_v54  ;;  %v2062_v32 = vmax.f32 %v2013_v38, 0.0 }
 0x293   : > { %v2249_v17 = vmax.f32 %v2173_v22, 0.0  ;;  %v1851_v55 = vpop.f32.mrf.mxu0 }
 0x296   : > { %v2014_v0 = vpop.f32.mrf.mxu2 }
 0x297   : > { %v2015_v58 = vadd.f32 %v2014_v0, %v1926_v42 }
 0x298   : > { %v1928_v15 = vpop.f32.mrf.mxu1  ;;  %v2174_v50 = vpop.f32.mrf.mxu3 }
 0x299   : > { %v2063_v28 = vmax.f32 %v2015_v58, 0.0  ;;  %v2175_v21 = vadd.f32 %v4255_v6, %v2174_v50  ;;  %v1929_v53 = vadd.f32 %v1928_v15, %v1840_v8 }
 0x29b   : > { %v2084_v23 = vpack.c.bf16 %v2063_v28, %v2062_v32  ;;  %v2250_v47 = vmax.f32 %v2175_v21, 0.0  ;;  %v1850_v21 = vadd.f32 %v1849_v36, %v4121_v29 }
 0x29d   : > { %2216 = vmatmul.bf16.gmra.mxu3 %v2084_v23  ;;  %v2280_v24 = vpack.c.bf16 %v2250_v47, %v2249_v17  ;;  %v1854_v17 = vpop.f32.mrf.mxu0  ;;  %v1852_v23 = vadd.f32 %v1851_v55, %v1763_v35 }
 0x29e   : > { %v2017_v30 = vpop.f32.mrf.mxu2 }
 0x29f   : > { %2376 = vmatmul.bf16.gmra.mxu0 %v2280_v24  ;;  %v2018_v27 = vadd.f32 %v2017_v30, %v1929_v53 }
 0x2a0   : > { %v1930_v57 = vpop.f32.mrf.mxu1  ;;  %v2177_v63 = vpop.f32.mrf.mxu3 }
 0x2a1   : > { %v1931_v10 = vadd.f32 %v1930_v57, %v1842_v52  ;;  %v2178_v25 = vadd.f32 %v4255_v6, %v2177_v63  ;;  %v2064_v60 = vmax.f32 %v2018_v27, 0.0 }
 0x2a3   : > { %v2251_v3 = vmax.f32 %v2178_v25, 0.0 }
 0x2a6   : > { %v2019_v31 = vpop.f32.mrf.mxu2 }
 0x2a7   : > { %v2020_v39 = vadd.f32 %v2019_v31, %v1931_v10  ;;  %v1856_v31 = vpop.f32.mrf.mxu0 }
 0x2a8   : > { %v1933_v59 = vpop.f32.mrf.mxu1  ;;  %v2179_v11 = vpop.f32.mrf.mxu3 }
 0x2a9   : > { %v2065_v1 = vmax.f32 %v2020_v39, 0.0  ;;  %v2180_v61 = vadd.f32 %v4255_v6, %v2179_v11  ;;  %v1934_v20 = vadd.f32 %v1933_v59, %v1845_v33  ;;  %v1768_v39 = vadd.f32 %v4145_v5, %v4143_v4 }
 0x2ab   : > { %v2085_v14 = vpack.c.bf16 %v2065_v1, %v2064_v60  ;;  %v2252_v13 = vmax.f32 %v2180_v61, 0.0  ;;  %v1855_v60 = vadd.f32 %v1854_v17, %v4134_v48  ;;  %v1857_v1 = vadd.f32 %v1856_v31, %v1768_v39 }
 0x2ad   : > { %2221 = vmatmul.bf16.gmra.mxu3 %v2085_v14  ;;  %v2281_v46 = vpack.c.bf16 %v2252_v13, %v2251_v3 }
 0x2ae   : > { %v2022_v2 = vpop.f32.mrf.mxu2 }
 0x2af   : > { %2381 = vmatmul.bf16.gmra.mxu0 %v2281_v46  ;;  %v2023_v40 = vadd.f32 %v2022_v2, %v1934_v20  ;;  %v1859_v13 = vpop.f32.mrf.mxu0 }
 0x2b0   : > { %v1935_v41 = vpop.f32.mrf.mxu1  ;;  %v2182_v44 = vpop.f32.mrf.mxu3 }
 0x2b1   : > { %v1936_v62 = vadd.f32 %v1935_v41, %v1847_v51  ;;  %v2183_v26 = vadd.f32 %v4255_v6, %v2182_v44  ;;  %v2066_v0 = vmax.f32 %v2023_v40, 0.0 }
 0x2b3   : > { %v2253_v34 = vmax.f32 %v2183_v26, 0.0  ;;  %v1860_v26 = vadd.f32 %v1859_v13, %v4150_v12 }
 0x2b6   : > { %v2024_v54 = vpop.f32.mrf.mxu2 }
 0x2b7   : > { %v2025_v56 = vadd.f32 %v2024_v54, %v1936_v62  ;;  %v1773_v62 = vadd.f32 %v4247_v7, %v4156_v43  ;;  %v1861_v54 = vpop.f32.mrf.mxu0 }
 0x2b8   : > { %v1938_v38 = vpop.f32.mrf.mxu1  ;;  %v2184_v42 = vpop.f32.mrf.mxu3 }
 0x2b9   : > { %v2067_v22 = vmax.f32 %v2025_v56, 0.0  ;;  %v2185_v16 = vadd.f32 %v4255_v6, %v2184_v42  ;;  %v1939_v47 = vadd.f32 %v1938_v38, %v1850_v21  ;;  %v1862_v38 = vadd.f32 %v1861_v54, %v1773_v62 }
 0x2bb   : > { %v2086_v58 = vpack.c.bf16 %v2067_v22, %v2066_v0  ;;  %v2254_v15 = vmax.f32 %v2185_v16, 0.0 }
 0x2bd   : > { %2226 = vmatmul.bf16.gmra.mxu3 %v2086_v58  ;;  %v2282_v49 = vpack.c.bf16 %v2254_v15, %v2253_v34 }
 0x2be   : > { %v2027_v50 = vpop.f32.mrf.mxu2 }
 0x2bf   : > { %2386 = vmatmul.bf16.gmra.mxu0 %v2282_v49  ;;  %v2028_v24 = vadd.f32 %v2027_v50, %v1939_v47 }
 0x2c0   : > { %v1940_v32 = vpop.f32.mrf.mxu1  ;;  %v2187_v28 = vpop.f32.mrf.mxu3 }
 0x2c1   : > { %v1941_v30 = vadd.f32 %v1940_v32, %v1852_v23  ;;  %v2188_v57 = vadd.f32 %v4255_v6, %v2187_v28  ;;  %v2068_v9 = vmax.f32 %v2028_v24, 0.0 }
 0x2c3   : > { %v2255_v45 = vmax.f32 %v2188_v57, 0.0 }
 0x2c6   : > { %v2029_v37 = vpop.f32.mrf.mxu2 }
 0x2c7   : > { %v2030_v63 = vadd.f32 %v2029_v37, %v1941_v30 }
 0x2c8   : > { %v1943_v8 = vpop.f32.mrf.mxu1  ;;  %v2189_v52 = vpop.f32.mrf.mxu3 }
 0x2c9   : > { %v2069_v53 = vmax.f32 %v2030_v63, 0.0  ;;  %v2190_v19 = vadd.f32 %v4255_v6, %v2189_v52  ;;  %v1944_v61 = vadd.f32 %v1943_v8, %v1855_v60  ;;  %v4297_v52 = vld [vmem:[%s4391_s6] ss:$0 sm:$0xff] }
 0x2cb   : > { %v2087_v27 = vpack.c.bf16 %v2069_v53, %v2068_v9  ;;  %v2256_v10 = vmax.f32 %v2190_v19, 0.0 }
 0x2cd   : > { %v2283_v29 = vpack.c.bf16 %v2256_v10, %v2255_v45  ;;  %2231 = vmatmul.bf16.gmra.mxu3 %v2087_v27 }
 0x2ce   : > { %v2032_v25 = vpop.f32.mrf.mxu2 }
 0x2cf   : > { %2391 = vmatmul.bf16.gmra.mxu0 %v2283_v29  ;;  %v2033_v3 = vadd.f32 %v2032_v25, %v1944_v61 }
 0x2d0   : > { %v1945_v59 = vpop.f32.mrf.mxu1  ;;  %v2192_v11 = vpop.f32.mrf.mxu3 }
 0x2d1   : > { %v1946_v14 = vadd.f32 %v1945_v59, %v1857_v1  ;;  %v2193_v46 = vadd.f32 %v4255_v6, %v2192_v11  ;;  %v2070_v44 = vmax.f32 %v2033_v3, 0.0 }
 0x2d3   : > { %v2257_v5 = vmax.f32 %v2193_v46, 0.0 }
 0x2d6   : > { %v2034_v36 = vpop.f32.mrf.mxu2 }
 0x2d7   : > { %v2035_v2 = vadd.f32 %v2034_v36, %v1946_v14 }
 0x2d8   : > { %v1948_v18 = vpop.f32.mrf.mxu1  ;;  %v2194_v41 = vpop.f32.mrf.mxu3 }
 0x2d9   : > { %v2071_v33 = vmax.f32 %v2035_v2, 0.0  ;;  %v2195_v4 = vadd.f32 %v4255_v6, %v2194_v41  ;;  %v1949_v42 = vadd.f32 %v1948_v18, %v1860_v26 }
 0x2db   : > { %v2088_v51 = vpack.c.bf16 %v2071_v33, %v2070_v44  ;;  %v2258_v20 = vmax.f32 %v2195_v4, 0.0 }
 0x2dd   : > { %v2284_v40 = vpack.c.bf16 %v2258_v20, %v2257_v5  ;;  %2236 = vmatmul.bf16.gmra.mxu3 %v2088_v51 }
 0x2de   : > { %v2037_v48 = vpop.f32.mrf.mxu2 }
 0x2df   : > { %2396 = vmatmul.bf16.gmra.mxu0 %v2284_v40  ;;  %v2038_v0 = vadd.f32 %v2037_v48, %v1949_v42 }
 0x2e0   : > { %v2197_v55 = vpop.f32.mrf.mxu3  ;;  %v1950_v56 = vpop.f32.mrf.mxu1 }
 0x2e1   : > { %v1951_v22 = vadd.f32 %v1950_v56, %v1862_v38  ;;  %v2198_v34 = vadd.f32 %v4255_v6, %v2197_v55  ;;  %v2072_v49 = vmax.f32 %v2038_v0, 0.0 }
 0x2e3   : > { %v2259_v43 = vmax.f32 %v2198_v34, 0.0 }
 0x2e6   : > { %v2039_v16 = vpop.f32.mrf.mxu2 }
 0x2e7   : > { %v2040_v58 = vadd.f32 %v2039_v16, %v1951_v22 }
 0x2e8   : > { %v2199_v15 = vpop.f32.mrf.mxu3 }
 0x2e9   : > { %v2073_v50 = vmax.f32 %v2040_v58, 0.0  ;;  %v2200_v35 = vadd.f32 %v4255_v6, %v2199_v15 }
 0x2eb   : > { %v2089_v7 = vpack.c.bf16 %v2073_v50, %v2072_v49  ;;  %v2260_v32 = vmax.f32 %v2200_v35, 0.0 }
 0x2ed   : > { %v2285_v28 = vpack.c.bf16 %v2260_v32, %v2259_v43  ;;  %2241 = vmatmul.bf16.gmra.mxu3 %v2089_v7 }
 0x2ef   : > { %2401 = vmatmul.bf16.gmra.mxu0 %v2285_v28 }
 0x2f0   : > { %v2202_v12 = vpop.f32.mrf.mxu3 }
 0x2f1   : > { %v2203_v21 = vadd.f32 %v4255_v6, %v2202_v12 }
 0x2f3   : > { %v2261_v47 = vmax.f32 %v2203_v21, 0.0 }
 0x2f8   : > { %v2204_v17 = vpop.f32.mrf.mxu3 }
 0x2f9   : > { %v2205_v23 = vadd.f32 %v4255_v6, %v2204_v17 }
 0x2fb   : > { %v2262_v24 = vmax.f32 %v2205_v23, 0.0 }
 0x2fd   : > { %v2286_v30 = vpack.c.bf16 %v2262_v24, %v2261_v47 }
 0x2ff   : > { %2406 = vmatmul.bf16.gmra.mxu0 %v2286_v30 }
 0x300   : > { %v2207_v37 = vpop.f32.mrf.mxu3 }
 0x301   : > { %v2208_v57 = vadd.f32 %v4255_v6, %v2207_v37 }
 0x303   : > { %v2263_v9 = vmax.f32 %v2208_v57, 0.0 }
 0x308   : > { %v2209_v63 = vpop.f32.mrf.mxu3 }
 0x309   : > { %v2210_v8 = vadd.f32 %v4255_v6, %v2209_v63 }
 0x30b   : > { %v2264_v53 = vmax.f32 %v2210_v8, 0.0 }
 0x30c   : > { %v2372_v19 = vpop.f32.mrf.mxu0 }
 0x30d   : > { %v2287_v45 = vpack.c.bf16 %v2264_v53, %v2263_v9  ;;  %v2373_v27 = vadd.f32 %v4297_v52, %v2372_v19 }
 0x30f   : > { %2452 = vst [vmem:[%s4302_s27] sm:$0xff] %v2373_v27  ;;  %2411 = vmatmul.bf16.gmra.mxu0 %v2287_v45 }
 0x310   : > { %v2212_v10 = vpop.f32.mrf.mxu3 }
 0x311   : > { %v2213_v25 = vadd.f32 %v4255_v6, %v2212_v10 }
 0x313   : > { %v2265_v11 = vmax.f32 %v2213_v25, 0.0 }
 0x314   : > { %v2374_v31 = vpop.f32.mrf.mxu0 }
 0x315   : > { %v2375_v29 = vadd.f32 %v4297_v52, %v2374_v31 }
 0x317   : > { %2453 = vst [vmem:[%s4302_s27 + $0x8] sm:$0xff] %v2375_v29 }
 0x318   : > { %v2214_v39 = vpop.f32.mrf.mxu3 }
 0x319   : > { %v2215_v59 = vadd.f32 %v4255_v6, %v2214_v39 }
 0x31b   : > { %v2266_v60 = vmax.f32 %v2215_v59, 0.0 }
 0x31c   : > { %v2377_v1 = vpop.f32.mrf.mxu0 }
 0x31d   : > { %v2288_v61 = vpack.c.bf16 %v2266_v60, %v2265_v11  ;;  %v2378_v3 = vadd.f32 %v4297_v52, %v2377_v1 }
 0x31f   : > { %2454 = vst [vmem:[%s4302_s27 + $0x10] sm:$0xff] %v2378_v3  ;;  %2416 = vmatmul.bf16.gmra.mxu0 %v2288_v61 }
 0x320   : > { %v2217_v14 = vpop.f32.mrf.mxu3 }
 0x321   : > { %v2218_v46 = vadd.f32 %v4255_v6, %v2217_v14 }
 0x323   : > { %v2267_v41 = vmax.f32 %v2218_v46, 0.0 }
 0x324   : > { %v2379_v13 = vpop.f32.mrf.mxu0 }
 0x325   : > { %v2380_v36 = vadd.f32 %v4297_v52, %v2379_v13 }
 0x327   : > { %2455 = vst [vmem:[%s4302_s27 + $0x18] sm:$0xff] %v2380_v36 }
 0x328   : > { %v2219_v2 = vpop.f32.mrf.mxu3 }
 0x329   : > { %v2220_v18 = vadd.f32 %v4255_v6, %v2219_v2 }
 0x32b   : > { %v2268_v44 = vmax.f32 %v2220_v18, 0.0 }
 0x32c   : > { %v2382_v33 = vpop.f32.mrf.mxu0 }
 0x32d   : > { %v2289_v4 = vpack.c.bf16 %v2268_v44, %v2267_v41  ;;  %v2383_v5 = vadd.f32 %v4297_v52, %v2382_v33 }
 0x32f   : > { %2456 = vst [vmem:[%s4302_s27 + $0x20] sm:$0xff] %v2383_v5  ;;  %2421 = vmatmul.bf16.gmra.mxu0 %v2289_v4 }
 0x330   : > { %v2222_v51 = vpop.f32.mrf.mxu3 }
 0x331   : > { %v2223_v48 = vadd.f32 %v4255_v6, %v2222_v51 }
 0x333   : > { %v2269_v55 = vmax.f32 %v2223_v48, 0.0 }
 0x334   : > { %v2384_v20 = vpop.f32.mrf.mxu0 }
 0x335   : > { %v2385_v40 = vadd.f32 %v4297_v52, %v2384_v20 }
 0x337   : > { %2457 = vst [vmem:[%s4302_s27 + $0x28] sm:$0xff] %v2385_v40 }
 0x338   : > { %v2224_v62 = vpop.f32.mrf.mxu3 }
 0x339   : > { %v2225_v54 = vadd.f32 %v4255_v6, %v2224_v62 }
 0x33b   : > { %v2270_v26 = vmax.f32 %v2225_v54, 0.0 }
 0x33c   : > { %v2387_v56 = vpop.f32.mrf.mxu0 }
 0x33d   : > { %v2290_v38 = vpack.c.bf16 %v2270_v26, %v2269_v55  ;;  %v2388_v42 = vadd.f32 %v4297_v52, %v2387_v56 }
 0x33f   : > { %2458 = vst [vmem:[%s4302_s27 + $0x30] sm:$0xff] %v2388_v42  ;;  %2426 = vmatmul.bf16.gmra.mxu0 %v2290_v38 }
 0x340   : > { %v2227_v0 = vpop.f32.mrf.mxu3 }
 0x341   : > { %v2228_v34 = vadd.f32 %v4255_v6, %v2227_v0 }
 0x343   : > { %v2271_v49 = vmax.f32 %v2228_v34, 0.0 }
 0x344   : > { %v2389_v22 = vpop.f32.mrf.mxu0 }
 0x345   : > { %v2390_v16 = vadd.f32 %v4297_v52, %v2389_v22 }
 0x347   : > { %2459 = vst [vmem:[%s4302_s27 + $0x38] sm:$0xff] %v2390_v16 }
 0x348   : > { %v2229_v58 = vpop.f32.mrf.mxu3 }
 0x349   : > { %v2230_v15 = vadd.f32 %v4255_v6, %v2229_v58 }
 0x34b   : > { %v2272_v50 = vmax.f32 %v2230_v15, 0.0 }
 0x34c   : > { %v2392_v35 = vpop.f32.mrf.mxu0 }
 0x34d   : > { %v2291_v43 = vpack.c.bf16 %v2272_v50, %v2271_v49  ;;  %v2393_v7 = vadd.f32 %v4297_v52, %v2392_v35 }
 0x34f   : > { %2460 = vst [vmem:[%s4302_s27 + $0x40] sm:$0xff] %v2393_v7  ;;  %2431 = vmatmul.bf16.gmra.mxu0 %v2291_v43 }
 0x350   : > { %v2232_v32 = vpop.f32.mrf.mxu3 }
 0x351   : > { %v2233_v21 = vadd.f32 %v4255_v6, %v2232_v32 }
 0x353   : > { %v2273_v47 = vmax.f32 %v2233_v21, 0.0 }
 0x354   : > { %v2394_v28 = vpop.f32.mrf.mxu0 }
 0x355   : > { %v2395_v12 = vadd.f32 %v4297_v52, %v2394_v28 }
 0x357   : > { %2461 = vst [vmem:[%s4302_s27 + $0x48] sm:$0xff] %v2395_v12 }
 0x358   : > { %v2234_v17 = vpop.f32.mrf.mxu3 }
 0x359   : > { %v2235_v23 = vadd.f32 %v4255_v6, %v2234_v17 }
 0x35b   : > { %v2274_v24 = vmax.f32 %v2235_v23, 0.0 }
 0x35c   : > { %v2397_v30 = vpop.f32.mrf.mxu0 }
 0x35d   : > { %v2292_v37 = vpack.c.bf16 %v2274_v24, %v2273_v47  ;;  %v2398_v57 = vadd.f32 %v4297_v52, %v2397_v30 }
 0x35f   : > { %2462 = vst [vmem:[%s4302_s27 + $0x50] sm:$0xff] %v2398_v57  ;;  %2436 = vmatmul.bf16.gmra.mxu0 %v2292_v37 }
 0x360   : > { %v2237_v63 = vpop.f32.mrf.mxu3 }
 0x361   : > { %v2238_v53 = vadd.f32 %v4255_v6, %v2237_v63 }
 0x363   : > { %v2275_v27 = vmax.f32 %v2238_v53, 0.0 }
 0x364   : > { %v2399_v8 = vpop.f32.mrf.mxu0 }
 0x365   : > { %v2400_v9 = vadd.f32 %v4297_v52, %v2399_v8 }
 0x367   : > { %2463 = vst [vmem:[%s4302_s27 + $0x58] sm:$0xff] %v2400_v9 }
 0x368   : > { %v2239_v19 = vpop.f32.mrf.mxu3 }
 0x369   : > { %v2240_v45 = vadd.f32 %v4255_v6, %v2239_v19 }
 0x36b   : > { %v2276_v10 = vmax.f32 %v2240_v45, 0.0 }
 0x36c   : > { %v2402_v31 = vpop.f32.mrf.mxu0 }
 0x36d   : > { %v2293_v29 = vpack.c.bf16 %v2276_v10, %v2275_v27  ;;  %v2403_v25 = vadd.f32 %v4297_v52, %v2402_v31 }
 0x36f   : > { %2464 = vst [vmem:[%s4302_s27 + $0x60] sm:$0xff] %v2403_v25  ;;  %2441 = vmatmul.bf16.gmra.mxu0 %v2293_v29 }
 0x370   : > { %v2242_v39 = vpop.f32.mrf.mxu3 }
 0x371   : > { %v2243_v60 = vadd.f32 %v4255_v6, %v2242_v39 }
 0x373   : > { %v2277_v3 = vmax.f32 %v2243_v60, 0.0 }
 0x374   : > { %v2404_v59 = vpop.f32.mrf.mxu0 }
 0x375   : > { %v2405_v11 = vadd.f32 %v4297_v52, %v2404_v59 }
 0x377   : > { %2465 = vst [vmem:[%s4302_s27 + $0x68] sm:$0xff] %v2405_v11 }
 0x378   : > { %v2244_v1 = vpop.f32.mrf.mxu3 }
 0x379   : > { %v2245_v61 = vadd.f32 %v4255_v6, %v2244_v1 }
 0x37b   : > { %v2278_v14 = vmax.f32 %v2245_v61, 0.0 }
 0x37c   : > { %v2407_v13 = vpop.f32.mrf.mxu0 }
 0x37d   : > { %v2294_v36 = vpack.c.bf16 %v2278_v14, %v2277_v3  ;;  %v2408_v46 = vadd.f32 %v4297_v52, %v2407_v13 }
 0x37f   : > { %2466 = vst [vmem:[%s4302_s27 + $0x70] sm:$0xff] %v2408_v46  ;;  %2446 = vmatmul.bf16.gmra.mxu0 %v2294_v36 }
 0x384   : > { %v2409_v2 = vpop.f32.mrf.mxu0 }
 0x385   : > { %v2410_v18 = vadd.f32 %v4297_v52, %v2409_v2 }
 0x387   : > { %2467 = vst [vmem:[%s4302_s27 + $0x78] sm:$0xff] %v2410_v18 }
 0x38c   : > { %v2412_v41 = vpop.f32.mrf.mxu0 }
 0x38d   : > { %v2413_v44 = vadd.f32 %v4297_v52, %v2412_v41 }
 0x38f   : > { %2468 = vst [vmem:[%s4302_s27 + $0x80] sm:$0xff] %v2413_v44 }
 0x394   : > { %v2414_v6 = vpop.f32.mrf.mxu0 }
 0x395   : > { %v2415_v33 = vadd.f32 %v4297_v52, %v2414_v6 }
 0x397   : > { %2469 = vst [vmem:[%s4302_s27 + $0x88] sm:$0xff] %v2415_v33 }
 0x39c   : > { %v2417_v4 = vpop.f32.mrf.mxu0 }
 0x39d   : > { %v2418_v5 = vadd.f32 %v4297_v52, %v2417_v4 }
 0x39f   : > { %2470 = vst [vmem:[%s4302_s27 + $0x90] sm:$0xff] %v2418_v5 }
 0x3a4   : > { %v2419_v51 = vpop.f32.mrf.mxu0 }
 0x3a5   : > { %v2420_v20 = vadd.f32 %v4297_v52, %v2419_v51 }
 0x3a7   : > { %2471 = vst [vmem:[%s4302_s27 + $0x98] sm:$0xff] %v2420_v20 }
 0x3ac   : > { %v2422_v40 = vpop.f32.mrf.mxu0 }
 0x3ad   : > { %v2423_v48 = vadd.f32 %v4297_v52, %v2422_v40 }
 0x3af   : > { %2472 = vst [vmem:[%s4302_s27 + $0xa0] sm:$0xff] %v2423_v48 }
 0x3b4   : > { %v2424_v62 = vpop.f32.mrf.mxu0 }
 0x3b5   : > { %v2425_v54 = vadd.f32 %v4297_v52, %v2424_v62 }
 0x3b7   : > { %2473 = vst [vmem:[%s4302_s27 + $0xa8] sm:$0xff] %v2425_v54 }
 0x3bc   : > { %v2427_v55 = vpop.f32.mrf.mxu0 }
 0x3bd   : > { %v2428_v26 = vadd.f32 %v4297_v52, %v2427_v55 }
 0x3bf   : > { %2474 = vst [vmem:[%s4302_s27 + $0xb0] sm:$0xff] %v2428_v26 }
 0x3c4   : > { %v2429_v56 = vpop.f32.mrf.mxu0 }
 0x3c5   : > { %v2430_v38 = vadd.f32 %v4297_v52, %v2429_v56 }
 0x3c7   : > { %2475 = vst [vmem:[%s4302_s27 + $0xb8] sm:$0xff] %v2430_v38 }
 0x3cc   : > { %v2432_v42 = vpop.f32.mrf.mxu0 }
 0x3cd   : > { %v2433_v0 = vadd.f32 %v4297_v52, %v2432_v42 }
 0x3cf   : > { %2476 = vst [vmem:[%s4302_s27 + $0xc0] sm:$0xff] %v2433_v0 }
 0x3d4   : > { %v2434_v22 = vpop.f32.mrf.mxu0 }
 0x3d5   : > { %v2435_v16 = vadd.f32 %v4297_v52, %v2434_v22 }
 0x3d7   : > { %2477 = vst [vmem:[%s4302_s27 + $0xc8] sm:$0xff] %v2435_v16 }
 0x3dc   : > { %v2437_v34 = vpop.f32.mrf.mxu0 }
 0x3dd   : > { %v2438_v58 = vadd.f32 %v4297_v52, %v2437_v34 }
 0x3df   : > { %2478 = vst [vmem:[%s4302_s27 + $0xd0] sm:$0xff] %v2438_v58 }
 0x3e4   : > { %v2439_v15 = vpop.f32.mrf.mxu0 }
 0x3e5   : > { %v2440_v49 = vadd.f32 %v4297_v52, %v2439_v15 }
 0x3e7   : > { %2479 = vst [vmem:[%s4302_s27 + $0xd8] sm:$0xff] %v2440_v49 }
 0x3ec   : > { %v2442_v50 = vpop.f32.mrf.mxu0 }
 0x3ed   : > { %v2443_v35 = vadd.f32 %v4297_v52, %v2442_v50 }
 0x3ef   : > { %2480 = vst [vmem:[%s4302_s27 + $0xe0] sm:$0xff] %v2443_v35 }
 0x3f4   : > { %v2444_v43 = vpop.f32.mrf.mxu0 }
 0x3f5   : > { %v2445_v7 = vadd.f32 %v4297_v52, %v2444_v43 }
 0x3f7   : > { %2481 = vst [vmem:[%s4302_s27 + $0xe8] sm:$0xff] %v2445_v7 }
 0x3fc   : > { %v2447_v32 = vpop.f32.mrf.mxu0 }
 0x3fd   : > { %v2448_v28 = vadd.f32 %v4297_v52, %v2447_v32 }
 0x3ff   : > { %2482 = vst [vmem:[%s4302_s27 + $0xf0] sm:$0xff] %v2448_v28 }
 0x404   : > { %v2449_v12 = vpop.f32.mrf.mxu0 }
 0x405   : > { %v2450_v21 = vadd.f32 %v4297_v52, %v2449_v12 }
 0x407   : > { %2483 = vst [vmem:[%s4302_s27 + $0xf8] sm:$0xff] %v2450_v21 }
 0x408 PF: > { %s17_s24 = sadd.s32 1, %s3494_s24  }
 0x409   : > { %p14_p4 = scmp.ge.s32.totalorder %s17_s24, 4  }
 0x40b   :  { %16 = sbr.rel (!%p14_p4) target bundleno = 1 (0x1), region = 78 }

</bundles_post_ra>
